<compile_context>
chip_gen: v7x
topology: tpu7x:2x2x1
jax: 0.10.0
libtpu: 0.0.40
codegen_flags: <defaults>
</compile_context>

<pallas_src>
import functools

import jax
import jax.numpy as jnp
import numpy as np
from jax import lax
from jax.experimental import pallas as pl
from jax.experimental.pallas import tpu as pltpu

BN_EPS = 1e-5
SIMAM_LAMBDA = 1e-4


# ---------------------------------------------------------------------------
# VMEM budget / tile pickers
# ---------------------------------------------------------------------------
@functools.lru_cache(maxsize=None)
def _vmem_limit_bytes():
    """Generation-aware scoped-VMEM budget (~60% of physical, capped)."""
    try:
        cap = int(pltpu.get_tpu_info().vmem_capacity_bytes)
    except Exception:
        cap = 64 << 20                       # v7x-safe fallback
    return int(max(32 << 20, min(int(cap * 0.6), 100 << 20)))


def _pick_lane_tile(hw, bytes_per_lane, budget_bytes):
    """Largest multiple-of-128 lane tile dividing hw within a byte budget."""
    if hw % 128 != 0:
        # TODO(synk): zero-pad HW to a multiple of 128 (excluding pad lanes
        # from SimAM counts / border masks) to restore lane tiling here.
        return hw
    cap = budget_bytes // max(1, bytes_per_lane)
    cap = max(128, (cap // 128) * 128)
    t = min(hw, cap)
    while hw % t != 0:
        t -= 128
    return int(t)


@functools.lru_cache(maxsize=None)
def _rowcol_maps(h, w):
    """(1, H*W) int32 row / col index maps (tiny; replaces the 9x masks DMA)."""
    yy, xx = np.meshgrid(np.arange(h, dtype=np.int32),
                         np.arange(w, dtype=np.int32), indexing="ij")
    return yy.reshape(1, h * w).copy(), xx.reshape(1, h * w).copy()


# ---------------------------------------------------------------------------
# Kernel 1: fused multi-branch 1x1 conv + folded BN + SiLU (+ channel split)
# ---------------------------------------------------------------------------
def fused_conv1x1_bn_silu(xs, ws, bs):
    """out_j = SiLU( ws[j] @ concat_i(xs[i]) + bs[j] ).

    xs : list of (N, Ci, HW) branch activations (C2f concat fused in-kernel
         via a contiguous VMEM scratch -> one big-K matmul, no HBM concat).
    ws : list of per-output BN-folded weights, ws[j] is (Cj, sum_i Ci)
         (multiple outputs fuse cv1's chunk(2, dim=1)).
    bs : list of (Cj, 1) f32 biases.
    """
    nb, nout = len(xs), len(ws)
    N, _, HW = xs[0].shape
    cis = [int(x.shape[1]) for x in xs]
    cjs = [int(w.shape[0]) for w in ws]
    sum_ci = sum(cis)
    assert all(int(w.shape[1]) == sum_ci for w in ws)

    x_item = jnp.dtype(xs[0].dtype).itemsize
    vmem_limit = _vmem_limit_bytes()
    w_bytes = (sum(int(np.prod(w.shape)) * jnp.dtype(w.dtype).itemsize for w in ws)
               + sum(int(np.prod(b.shape)) * 4 for b in bs))
    # Real working set per lane: double-buffered inputs + outputs, plus the
    # single-buffered concat scratch when there is more than one branch.
    bytes_per_lane = 2 * (sum_ci + sum(cjs)) * x_item + (sum_ci * x_item if nb > 1 else 0)
    budget = max(int(vmem_limit * 0.75) - 2 * w_bytes, 2 << 20)
    thw = _pick_lane_tile(HW, bytes_per_lane, budget)

    def kernel(*refs):
        x_refs = refs[:nb]
        w_refs = refs[nb:nb + nout]
        b_refs = refs[nb + nout:nb + 2 * nout]
        o_refs = refs[nb + 2 * nout:nb + 2 * nout + nout]
        if nb > 1:
            cat_ref = refs[-1]                      # (sum_ci, thw) VMEM scratch
            off = 0
            for i in range(nb):
                cat_ref[pl.ds(off, cis[i]), :] = x_refs[i][0]
                off += cis[i]
            xcat = cat_ref[...]
        else:
            xcat = x_refs[0][0]
        for j in range(nout):
            y = jnp.dot(w_refs[j][...], xcat, preferred_element_type=jnp.float32)
            y = y + b_refs[j][...]                  # folded BN bias
            o_refs[j][0] = (y * jax.nn.sigmoid(y)).astype(o_refs[j].dtype)

    in_specs = (
        [pl.BlockSpec((1, ci, thw), lambda n, t: (n, 0, t)) for ci in cis]
        + [pl.BlockSpec((int(w.shape[0]), int(w.shape[1])), lambda n, t: (0, 0))
           for w in ws]
        + [pl.BlockSpec((int(b.shape[0]), 1), lambda n, t: (0, 0)) for b in bs]
    )
    out_specs = [pl.BlockSpec((1, cj, thw), lambda n, t: (n, 0, t)) for cj in cjs]
    out_shape = [jax.ShapeDtypeStruct((N, cj, HW), xs[0].dtype) for cj in cjs]
    scratch = [pltpu.VMEM((sum_ci, thw), xs[0].dtype)] if nb > 1 else []

    outs = pl.pallas_call(
        kernel,
        grid=(N, HW // thw),
        in_specs=in_specs,
        out_specs=out_specs,
        out_shape=out_shape,
        scratch_shapes=scratch,
        compiler_params=pltpu.CompilerParams(
            dimension_semantics=("parallel", "parallel"),
            vmem_limit_bytes=vmem_limit),
    )(*xs, *ws, *bs)
    return outs if nout > 1 else outs[0]


# ---------------------------------------------------------------------------
# Kernel 2: fused 3x3 conv (pad=1, stride=1) + folded BN + SiLU
#           + optional fused SimAM attention + optional fused residual.
# ---------------------------------------------------------------------------
def fused_conv3x3_bn_silu(x, w, b, H, W, apply_simam=False, residual=None):
    """x: (N, Cin, H*W); w: (Cout, 9*Cin) BN-folded tap-major; b: (Cout, 1) f32.

    im2col happens in VMEM: each tap is a lane rotation (XLU) of the input
    tile times an in-kernel border mask (VPU), written into a stacked
    (9*Cin, HW) scratch; one MXU matmul with K = 9*Cin does the whole conv.
    If apply_simam, the SimAM attention (per-channel spatial mean/var over the
    lane-resident HW axis) and the optional shortcut residual are applied in
    the same epilogue before the single HBM store.
    """
    N, Cin, HW = x.shape
    assert HW == H * W
    Cout = int(w.shape[0])
    assert int(w.shape[1]) == 9 * Cin
    row_np, col_np = _rowcol_maps(H, W)
    row_map, col_map = jnp.asarray(row_np), jnp.asarray(col_np)
    vmem_limit = _vmem_limit_bytes()
    has_res = residual is not None

    def kernel(*refs):
        if has_res:
            x_ref, w_ref, b_ref, row_ref, col_ref, res_ref, o_ref, taps_ref = refs
        else:
            x_ref, w_ref, b_ref, row_ref, col_ref, o_ref, taps_ref = refs
            res_ref = None
        xv = x_ref[0]                                   # (Cin, HW)
        row = row_ref[...]                              # (1, HW) int32
        col = col_ref[...]
        # Build the stacked im2col operand in VMEM scratch (bounds live ranges).
        for dy in range(3):
            for dx in range(3):
                tap = dy * 3 + dx
                if (dy, dx) == (1, 1):
                    taps_ref[pl.ds(tap * Cin, Cin), :] = xv
                    continue
                off = (dy - 1) * W + (dx - 1)           # flattened tap offset
                shifted = pltpu.roll(xv, shift=(-off) % HW, axis=1)  # x[p+off]
                rr = row + (dy - 1)
                cc = col + (dx - 1)
                m = ((rr >= 0) & (rr < H) & (cc >= 0) & (cc < W)).astype(xv.dtype)
                taps_ref[pl.ds(tap * Cin, Cin), :] = shifted * m
        # Single big-K matmul: (Cout, 9*Cin) x (9*Cin, HW), f32 accumulation.
        y = jnp.dot(w_ref[...], taps_ref[...], preferred_element_type=jnp.float32)
        y = y + b_ref[...]
        y = y * jax.nn.sigmoid(y)                       # SiLU (EUP)
        if apply_simam:
            inv_n = 1.0 / float(HW - 1)
            mu = jnp.mean(y, axis=1, keepdims=True)     # XLU lane reduce
            d = (y - mu) * (y - mu)
            v = jnp.sum(d, axis=1, keepdims=True)
            inv = pl.reciprocal(4.0 * (v * inv_n + SIMAM_LAMBDA), approx=True)
            att = d * inv + 0.5
            y = y * jax.nn.sigmoid(att)
        if res_ref is not None:                         # fused shortcut add
            y = y + res_ref[0].astype(jnp.float32)
        o_ref[0] = y.astype(o_ref.dtype)

    in_specs = [
        pl.BlockSpec((1, Cin, HW), lambda n: (n, 0, 0)),
        pl.BlockSpec((Cout, 9 * Cin), lambda n: (0, 0)),
        pl.BlockSpec((Cout, 1), lambda n: (0, 0)),
        pl.BlockSpec((1, HW), lambda n: (0, 0)),
        pl.BlockSpec((1, HW), lambda n: (0, 0)),
    ]
    args = [x, w, b, row_map, col_map]
    if has_res:
        in_specs.append(pl.BlockSpec((1, Cout, HW), lambda n: (n, 0, 0)))
        args.append(residual)

    return pl.pallas_call(
        kernel,
        grid=(N,),
        in_specs=in_specs,
        out_specs=pl.BlockSpec((1, Cout, HW), lambda n: (n, 0, 0)),
        out_shape=jax.ShapeDtypeStruct((N, Cout, HW), x.dtype),
        scratch_shapes=[pltpu.VMEM((9 * Cin, HW), x.dtype)],
        compiler_params=pltpu.CompilerParams(
            dimension_semantics=("parallel",),
            vmem_limit_bytes=vmem_limit),
    )(*args)


# ---------------------------------------------------------------------------
# Parameter init (deterministic) + Pallas-side prep (BN folded into weights)
# ---------------------------------------------------------------------------
def init_conv(key, cin, cout, k):
    kw, kg, kb, km, kv = jax.random.split(key, 5)
    w = jax.random.normal(kw, (cout, cin, k, k), jnp.float32) / np.sqrt(cin * k * k)
    gamma = 1.0 + 0.1 * jax.random.normal(kg, (cout,), jnp.float32)
    beta = 0.1 * jax.random.normal(kb, (cout,), jnp.float32)
    mean = 0.1 * jax.random.normal(km, (cout,), jnp.float32)
    var = 0.9 + 0.1 * jnp.abs(jax.random.normal(kv, (cout,), jnp.float32))
    scale = gamma / jnp.sqrt(var + BN_EPS)
    bias = beta - mean * scale
    return {"w": w, "scale": scale, "bias": bias}


def init_c2f_simam(key, c1, c2, n=1, e=0.5):
    c = int(c2 * e)
    keys = jax.random.split(key, 2 + 2 * n)
    return {
        "c": c,
        "cv1": init_conv(keys[0], c1, 2 * c, 1),
        "cv2": init_conv(keys[1], (2 + n) * c, c2, 1),
        "m": [
            {"cv1": init_conv(keys[2 + 2 * i], c, c, 3),
             "cv2": init_conv(keys[3 + 2 * i], c, c, 3)}
            for i in range(n)
        ],
    }


def prepare_pallas_params(params, dtype=jnp.float32):
    """Fold BN into conv weights, reshape 3x3 weights to (Cout, 9*Cin) tap-major,
    pre-slice cv1 (chunk) and keep cv2's weight whole (concat fused in-kernel).
    `dtype` selects the activation/weight storage dtype (f32 or bf16); all MXU
    accumulation and epilogue math stays in f32."""
    def fold(p):
        w = p["w"] * p["scale"][:, None, None, None]
        return w, p["bias"][:, None].astype(jnp.float32)

    c = params["c"]

    w1, b1 = fold(params["cv1"])                      # (2c, c1, 1, 1)
    w1 = w1[:, :, 0, 0].astype(dtype)
    cv1 = {"ws": [w1[:c], w1[c:]], "bs": [b1[:c], b1[c:]]}     # fused chunk(2)

    w2, b2 = fold(params["cv2"])                      # (c2, (2+n)c, 1, 1)
    cv2 = {"ws": [w2[:, :, 0, 0].astype(dtype)], "bs": [b2]}   # fused concat

    ms = []
    for mp in params["m"]:
        d = {}
        for name in ("cv1", "cv2"):
            wf, bf = fold(mp[name])                   # (c, c, 3, 3)
            wflat = jnp.transpose(wf, (0, 2, 3, 1)).reshape(
                wf.shape[0], 9 * wf.shape[1]).astype(dtype)    # tap-major K
            d[name] = {"w": wflat, "b": bf}
        ms.append(d)

    return {"c": c, "cv1": cv1, "cv2": cv2, "m": ms}


# ---------------------------------------------------------------------------
# C2f_SimAM forward (Pallas path).  NCHW in / NCHW out, no transposes.
# ---------------------------------------------------------------------------
def c2f_simam_forward(pparams, x_nchw, shortcut=False):
    N, C1, H, W = x_nchw.shape
    dtype = pparams["cv1"]["ws"][0].dtype
    # NCHW is already channels-on-sublanes / spatial-on-lanes: reshape is free.
    x = x_nchw.reshape(N, C1, H * W).astype(dtype)

    y = list(fused_conv1x1_bn_silu([x], pparams["cv1"]["ws"], pparams["cv1"]["bs"]))
    for mp in pparams["m"]:
        z = y[-1]
        h = fused_conv3x3_bn_silu(z, mp["cv1"]["w"], mp["cv1"]["b"], H, W,
                                  apply_simam=False)
        h = fused_conv3x3_bn_silu(h, mp["cv2"]["w"], mp["cv2"]["b"], H, W,
                                  apply_simam=True,
                                  residual=(z if shortcut else None))
        y.append(h)
    out = fused_conv1x1_bn_silu(y, pparams["cv2"]["ws"], pparams["cv2"]["bs"])
    return out.reshape(N, out.shape[1], H, W)


# ---------------------------------------------------------------------------
# Pure-JAX reference (for in-script correctness check)
# ---------------------------------------------------------------------------
def _ref_conv_bn_silu(x_nchw, p, k):
    pad = k // 2
    out = lax.conv_general_dilated(
        x_nchw, p["w"], window_strides=(1, 1),
        padding=((pad, pad), (pad, pad)),
        dimension_numbers=("NCHW", "OIHW", "NCHW"),
        precision=lax.Precision.HIGHEST)
    y = out * p["scale"].reshape(1, -1, 1, 1) + p["bias"].reshape(1, -1, 1, 1)
    return y * jax.nn.sigmoid(y)


def _ref_simam(x):
    mu = jnp.mean(x, axis=(2, 3), keepdims=True)
    d = (x - mu) ** 2
    n = x.shape[2] * x.shape[3] - 1
    y = d / (4.0 * (jnp.sum(d, axis=(2, 3), keepdims=True) / n + SIMAM_LAMBDA)) + 0.5
    return x * jax.nn.sigmoid(y)


def ref_forward(params, x, shortcut=False):
    c = params["c"]
    t = _ref_conv_bn_silu(x, params["cv1"], 1)
    y = [t[:, :c], t[:, c:]]
    for mp in params["m"]:
        z = y[-1]
        h = _ref_conv_bn_silu(z, mp["cv1"], 3)
        h = _ref_conv_bn_silu(h, mp["cv2"], 3)
        h = _ref_simam(h)
        if shortcut:
            h = z + h
        y.append(h)
    return _ref_conv_bn_silu(jnp.concatenate(y, axis=1), params["cv2"], 1)


if __name__ == "__main__":
    key = jax.random.PRNGKey(0)
    kx, kp = jax.random.split(key)
    # c1 = c2 = 4, n = 1, e = 0.5  ->  hidden c = 2
    x = jax.random.normal(kx, (2, 4, 16, 16), jnp.float32)    # NCHW
    params = init_c2f_simam(kp, c1=4, c2=4, n=1, e=0.5)

    fwd = jax.jit(c2f_simam_forward, static_argnames=("shortcut",))

    # f32 path (strict correctness check)
    pparams = prepare_pallas_params(params, dtype=jnp.float32)
    out = jax.block_until_ready(fwd(pparams, x))
    assert out.shape == (2, 4, 16, 16)
    ref = ref_forward(params, x)
    np.testing.assert_allclose(np.asarray(out), np.asarray(ref), rtol=5e-3, atol=5e-3)

    # shortcut=True path exercises the fused residual in the SimAM epilogue
    out_sc = jax.block_until_ready(fwd(pparams, x, shortcut=True))
    ref_sc = ref_forward(params, x, shortcut=True)
    np.testing.assert_allclose(np.asarray(out_sc), np.asarray(ref_sc),
                               rtol=5e-3, atol=5e-3)

    # bf16 production path (halved HBM traffic / VMEM; f32 accumulation)
    pparams_bf16 = prepare_pallas_params(params, dtype=jnp.bfloat16)
    out_bf16 = jax.block_until_ready(fwd(pparams_bf16, x))
    np.testing.assert_allclose(np.asarray(out_bf16.astype(jnp.float32)),
                               np.asarray(ref), rtol=1e-1, atol=1e-1)

    print("KERNEL_OK")
</pallas_src>

<mosaic_0001>
module attributes {stable_mosaic.version = 11 : i64} {
  func.func @kernel(%arg0: i32, %arg1: i32, %arg2: memref<1x2x256xf32, #tpu.memory_space<vmem>>, %arg3: memref<1x2x256xf32, #tpu.memory_space<vmem>>, %arg4: memref<1x2x256xf32, #tpu.memory_space<vmem>>, %arg5: memref<4x6xf32, #tpu.memory_space<vmem>>, %arg6: memref<4x1xf32, #tpu.memory_space<vmem>>, %arg7: memref<1x4x256xf32, #tpu.memory_space<vmem>>, %arg8: memref<6x256xf32, #tpu.memory_space<vmem>>) attributes {dimension_semantics = [#tpu.dimension_semantics<parallel>, #tpu.dimension_semantics<parallel>], iteration_bounds = array<i64: 2, 1>, scalar_prefetch = 0 : i64, scratch_operands = 1 : i64, tpu.core_type = #tpu.core_type<tc>, window_params = [{transform_indices = @transform_0, window_bounds = array<i64: 1, 2, 256>}, {transform_indices = @transform_1, window_bounds = array<i64: 1, 2, 256>}, {transform_indices = @transform_2, window_bounds = array<i64: 1, 2, 256>}, {pipeline_mode = #tpu.pipeline_mode<synchronous>, transform_indices = @transform_3, window_bounds = array<i64: 4, 6>}, {pipeline_mode = #tpu.pipeline_mode<synchronous>, transform_indices = @transform_4, window_bounds = array<i64: 4, 1>}, {transform_indices = @transform_5, window_bounds = array<i64: 1, 4, 256>}]} {
    %c0 = arith.constant 0 : index
    %c0_0 = arith.constant 0 : index
    %c0_1 = arith.constant 0 : index
    %0 = vector.load %arg2[%c0, %c0_0, %c0_1] : memref<1x2x256xf32, #tpu.memory_space<vmem>>, vector<1x2x256xf32>
    %1 = vector.shape_cast %0 : vector<1x2x256xf32> to vector<2x256xf32>
    %c0_2 = arith.constant 0 : index
    %c0_3 = arith.constant 0 : index
    %2 = vector.load %arg8[%c0_2, %c0_3] : memref<6x256xf32, #tpu.memory_space<vmem>>, vector<2x256xf32>
    tpu.vector_store %arg8[%c0_2, %c0_3], %1 {strides = array<i32>} : memref<6x256xf32, #tpu.memory_space<vmem>>, vector<2x256xf32>,
    %c0_4 = arith.constant 0 : index
    %c0_5 = arith.constant 0 : index
    %c0_6 = arith.constant 0 : index
    %3 = vector.load %arg3[%c0_4, %c0_5, %c0_6] : memref<1x2x256xf32, #tpu.memory_space<vmem>>, vector<1x2x256xf32>
    %4 = vector.shape_cast %3 : vector<1x2x256xf32> to vector<2x256xf32>
    %c2 = arith.constant 2 : index
    %c0_7 = arith.constant 0 : index
    %5 = vector.load %arg8[%c2, %c0_7] : memref<6x256xf32, #tpu.memory_space<vmem>>, vector<2x256xf32>
    tpu.vector_store %arg8[%c2, %c0_7], %4 {strides = array<i32>} : memref<6x256xf32, #tpu.memory_space<vmem>>, vector<2x256xf32>,
    %c0_8 = arith.constant 0 : index
    %c0_9 = arith.constant 0 : index
    %c0_10 = arith.constant 0 : index
    %6 = vector.load %arg4[%c0_8, %c0_9, %c0_10] : memref<1x2x256xf32, #tpu.memory_space<vmem>>, vector<1x2x256xf32>
    %7 = vector.shape_cast %6 : vector<1x2x256xf32> to vector<2x256xf32>
    %c4 = arith.constant 4 : index
    %c0_11 = arith.constant 0 : index
    %8 = vector.load %arg8[%c4, %c0_11] : memref<6x256xf32, #tpu.memory_space<vmem>>, vector<2x256xf32>
    tpu.vector_store %arg8[%c4, %c0_11], %7 {strides = array<i32>} : memref<6x256xf32, #tpu.memory_space<vmem>>, vector<2x256xf32>,
    %c0_12 = arith.constant 0 : index
    %c0_13 = arith.constant 0 : index
    %9 = vector.load %arg8[%c0_12, %c0_13] : memref<6x256xf32, #tpu.memory_space<vmem>>, vector<6x256xf32>
    %c0_14 = arith.constant 0 : index
    %c0_15 = arith.constant 0 : index
    %10 = vector.load %arg5[%c0_14, %c0_15] : memref<4x6xf32, #tpu.memory_space<vmem>>, vector<4x6xf32>
    %cst = arith.constant dense<0.000000e+00> : vector<4x256xf32>
    %11 = tpu.matmul %10, %9, %cst {dimension_numbers = #tpu.dot_dimension_numbers<[1], [0], [0], [1], [0, 0, 1, 1], [], []>} : vector<4x6xf32>, vector<6x256xf32>, vector<4x256xf32> -> vector<4x256xf32>
    %c0_16 = arith.constant 0 : index
    %c0_17 = arith.constant 0 : index
    %12 = vector.load %arg6[%c0_16, %c0_17] : memref<4x1xf32, #tpu.memory_space<vmem>>, vector<4x1xf32>
    %13 = vector.broadcast %12 : vector<4x1xf32> to vector<4x256xf32>
    %14 = arith.addf %11, %13 : vector<4x256xf32>
    %15 = arith.negf %14 : vector<4x256xf32>
    %16 = math.exp %15 : vector<4x256xf32>
    %cst_18 = arith.constant 1.000000e+00 : f32
    %17 = vector.broadcast %cst_18 : f32 to vector<4x256xf32>
    %18 = arith.addf %17, %16 : vector<4x256xf32>
    %19 = arith.divf %17, %18 : vector<4x256xf32>
    %20 = arith.mulf %14, %19 : vector<4x256xf32>
    %c0_19 = arith.constant 0 : index
    %c0_20 = arith.constant 0 : index
    %c0_21 = arith.constant 0 : index
    %21 = vector.load %arg7[%c0_19, %c0_20, %c0_21] : memref<1x4x256xf32, #tpu.memory_space<vmem>>, vector<1x4x256xf32>
    %22 = vector.shape_cast %21 : vector<1x4x256xf32> to vector<4x256xf32>
    %23 = vector.shape_cast %20 : vector<4x256xf32> to vector<1x4x256xf32>
    tpu.vector_store %arg7[%c0_19, %c0_20, %c0_21], %23 {strides = array<i32>} : memref<1x4x256xf32, #tpu.memory_space<vmem>>, vector<1x4x256xf32>,
    return
  }
  func.func @transform_0(%arg0: i32, %arg1: i32) -> (i32, i32, i32) {
    %c0_i32 = arith.constant 0 : i32
    %c0_i32_0 = arith.constant 0 : i32
    return %arg0, %c0_i32, %arg1 : i32, i32, i32
  }
  func.func @transform_1(%arg0: i32, %arg1: i32) -> (i32, i32, i32) {
    %c0_i32 = arith.constant 0 : i32
    %c0_i32_0 = arith.constant 0 : i32
    return %arg0, %c0_i32, %arg1 : i32, i32, i32
  }
  func.func @transform_2(%arg0: i32, %arg1: i32) -> (i32, i32, i32) {
    %c0_i32 = arith.constant 0 : i32
    %c0_i32_0 = arith.constant 0 : i32
    return %arg0, %c0_i32, %arg1 : i32, i32, i32
  }
  func.func @transform_3(%arg0: i32, %arg1: i32) -> (i32, i32) {
    %c0_i32 = arith.constant 0 : i32
    %c0_i32_0 = arith.constant 0 : i32
    %c0_i32_1 = arith.constant 0 : i32
    return %c0_i32, %c0_i32_0 : i32, i32
  }
  func.func @transform_4(%arg0: i32, %arg1: i32) -> (i32, i32) {
    %c0_i32 = arith.constant 0 : i32
    %c0_i32_0 = arith.constant 0 : i32
    %c0_i32_1 = arith.constant 0 : i32
    return %c0_i32, %c0_i32_0 : i32, i32
  }
  func.func @transform_5(%arg0: i32, %arg1: i32) -> (i32, i32, i32) {
    %c0_i32 = arith.constant 0 : i32
    %c0_i32_0 = arith.constant 0 : i32
    return %arg0, %c0_i32, %arg1 : i32, i32, i32
  }
}

module attributes {stable_mosaic.version = 11 : i64} {
  func.func @kernel(%arg0: i32, %arg1: i32, %arg2: memref<1x4x256xf32, #tpu.memory_space<vmem>>, %arg3: memref<2x4xf32, #tpu.memory_space<vmem>>, %arg4: memref<2x4xf32, #tpu.memory_space<vmem>>, %arg5: memref<2x1xf32, #tpu.memory_space<vmem>>, %arg6: memref<2x1xf32, #tpu.memory_space<vmem>>, %arg7: memref<1x2x256xf32, #tpu.memory_space<vmem>>, %arg8: memref<1x2x256xf32, #tpu.memory_space<vmem>>) attributes {dimension_semantics = [#tpu.dimension_semantics<parallel>, #tpu.dimension_semantics<parallel>], iteration_bounds = array<i64: 2, 1>, scalar_prefetch = 0 : i64, scratch_operands = 0 : i64, tpu.core_type = #tpu.core_type<tc>, window_params = [{transform_indices = @transform_0, window_bounds = array<i64: 1, 4, 256>}, {pipeline_mode = #tpu.pipeline_mode<synchronous>, transform_indices = @transform_1, window_bounds = array<i64: 2, 4>}, {pipeline_mode = #tpu.pipeline_mode<synchronous>, transform_indices = @transform_2, window_bounds = array<i64: 2, 4>}, {pipeline_mode = #tpu.pipeline_mode<synchronous>, transform_indices = @transform_3, window_bounds = array<i64: 2, 1>}, {pipeline_mode = #tpu.pipeline_mode<synchronous>, transform_indices = @transform_4, window_bounds = array<i64: 2, 1>}, {transform_indices = @transform_5, window_bounds = array<i64: 1, 2, 256>}, {transform_indices = @transform_6, window_bounds = array<i64: 1, 2, 256>}]} {
    %c0 = arith.constant 0 : index
    %c0_0 = arith.constant 0 : index
    %c0_1 = arith.constant 0 : index
    %0 = vector.load %arg2[%c0, %c0_0, %c0_1] : memref<1x4x256xf32, #tpu.memory_space<vmem>>, vector<1x4x256xf32>
    %1 = vector.shape_cast %0 : vector<1x4x256xf32> to vector<4x256xf32>
    %c0_2 = arith.constant 0 : index
    %c0_3 = arith.constant 0 : index
    %2 = vector.load %arg3[%c0_2, %c0_3] : memref<2x4xf32, #tpu.memory_space<vmem>>, vector<2x4xf32>
    %cst = arith.constant dense<0.000000e+00> : vector<2x256xf32>
    %3 = tpu.matmul %2, %1, %cst {dimension_numbers = #tpu.dot_dimension_numbers<[1], [0], [0], [1], [0, 0, 1, 1], [], []>} : vector<2x4xf32>, vector<4x256xf32>, vector<2x256xf32> -> vector<2x256xf32>
    %c0_4 = arith.constant 0 : index
    %c0_5 = arith.constant 0 : index
    %4 = vector.load %arg5[%c0_4, %c0_5] : memref<2x1xf32, #tpu.memory_space<vmem>>, vector<2x1xf32>
    %5 = vector.broadcast %4 : vector<2x1xf32> to vector<2x256xf32>
    %6 = arith.addf %3, %5 : vector<2x256xf32>
    %7 = arith.negf %6 : vector<2x256xf32>
    %8 = math.exp %7 : vector<2x256xf32>
    %cst_6 = arith.constant 1.000000e+00 : f32
    %9 = vector.broadcast %cst_6 : f32 to vector<2x256xf32>
    %10 = arith.addf %9, %8 : vector<2x256xf32>
    %11 = arith.divf %9, %10 : vector<2x256xf32>
    %12 = arith.mulf %6, %11 : vector<2x256xf32>
    %c0_7 = arith.constant 0 : index
    %c0_8 = arith.constant 0 : index
    %c0_9 = arith.constant 0 : index
    %13 = vector.load %arg7[%c0_7, %c0_8, %c0_9] : memref<1x2x256xf32, #tpu.memory_space<vmem>>, vector<1x2x256xf32>
    %14 = vector.shape_cast %13 : vector<1x2x256xf32> to vector<2x256xf32>
    %15 = vector.shape_cast %12 : vector<2x256xf32> to vector<1x2x256xf32>
    tpu.vector_store %arg7[%c0_7, %c0_8, %c0_9], %15 {strides = array<i32>} : memref<1x2x256xf32, #tpu.memory_space<vmem>>, vector<1x2x256xf32>,
    %c0_10 = arith.constant 0 : index
    %c0_11 = arith.constant 0 : index
    %16 = vector.load %arg4[%c0_10, %c0_11] : memref<2x4xf32, #tpu.memory_space<vmem>>, vector<2x4xf32>
    %cst_12 = arith.constant dense<0.000000e+00> : vector<2x256xf32>
    %17 = tpu.matmul %16, %1, %cst_12 {dimension_numbers = #tpu.dot_dimension_numbers<[1], [0], [0], [1], [0, 0, 1, 1], [], []>} : vector<2x4xf32>, vector<4x256xf32>, vector<2x256xf32> -> vector<2x256xf32>
    %c0_13 = arith.constant 0 : index
    %c0_14 = arith.constant 0 : index
    %18 = vector.load %arg6[%c0_13, %c0_14] : memref<2x1xf32, #tpu.memory_space<vmem>>, vector<2x1xf32>
    %19 = vector.broadcast %18 : vector<2x1xf32> to vector<2x256xf32>
    %20 = arith.addf %17, %19 : vector<2x256xf32>
    %21 = arith.negf %20 : vector<2x256xf32>
    %22 = math.exp %21 : vector<2x256xf32>
    %cst_15 = arith.constant 1.000000e+00 : f32
    %23 = vector.broadcast %cst_15 : f32 to vector<2x256xf32>
    %24 = arith.addf %23, %22 : vector<2x256xf32>
    %25 = arith.divf %23, %24 : vector<2x256xf32>
    %26 = arith.mulf %20, %25 : vector<2x256xf32>
    %c0_16 = arith.constant 0 : index
    %c0_17 = arith.constant 0 : index
    %c0_18 = arith.constant 0 : index
    %27 = vector.load %arg8[%c0_16, %c0_17, %c0_18] : memref<1x2x256xf32, #tpu.memory_space<vmem>>, vector<1x2x256xf32>
    %28 = vector.shape_cast %27 : vector<1x2x256xf32> to vector<2x256xf32>
    %29 = vector.shape_cast %26 : vector<2x256xf32> to vector<1x2x256xf32>
    tpu.vector_store %arg8[%c0_16, %c0_17, %c0_18], %29 {strides = array<i32>} : memref<1x2x256xf32, #tpu.memory_space<vmem>>, vector<1x2x256xf32>,
    return
  }
  func.func @transform_0(%arg0: i32, %arg1: i32) -> (i32, i32, i32) {
    %c0_i32 = arith.constant 0 : i32
    %c0_i32_0 = arith.constant 0 : i32
    return %arg0, %c0_i32, %arg1 : i32, i32, i32
  }
  func.func @transform_1(%arg0: i32, %arg1: i32) -> (i32, i32) {
    %c0_i32 = arith.constant 0 : i32
    %c0_i32_0 = arith.constant 0 : i32
    %c0_i32_1 = arith.constant 0 : i32
    return %c0_i32, %c0_i32_0 : i32, i32
  }
  func.func @transform_2(%arg0: i32, %arg1: i32) -> (i32, i32) {
    %c0_i32 = arith.constant 0 : i32
    %c0_i32_0 = arith.constant 0 : i32
    %c0_i32_1 = arith.constant 0 : i32
    return %c0_i32, %c0_i32_0 : i32, i32
  }
  func.func @transform_3(%arg0: i32, %arg1: i32) -> (i32, i32) {
    %c0_i32 = arith.constant 0 : i32
    %c0_i32_0 = arith.constant 0 : i32
    %c0_i32_1 = arith.constant 0 : i32
    return %c0_i32, %c0_i32_0 : i32, i32
  }
  func.func @transform_4(%arg0: i32, %arg1: i32) -> (i32, i32) {
    %c0_i32 = arith.constant 0 : i32
    %c0_i32_0 = arith.constant 0 : i32
    %c0_i32_1 = arith.constant 0 : i32
    return %c0_i32, %c0_i32_0 : i32, i32
  }
  func.func @transform_5(%arg0: i32, %arg1: i32) -> (i32, i32, i32) {
    %c0_i32 = arith.constant 0 : i32
    %c0_i32_0 = arith.constant 0 : i32
    return %arg0, %c0_i32, %arg1 : i32, i32, i32
  }
  func.func @transform_6(%arg0: i32, %arg1: i32) -> (i32, i32, i32) {
    %c0_i32 = arith.constant 0 : i32
    %c0_i32_0 = arith.constant 0 : i32
    return %arg0, %c0_i32, %arg1 : i32, i32, i32
  }
}

module attributes {stable_mosaic.version = 11 : i64} {
  func.func @kernel(%arg0: i32, %arg1: memref<1x2x256xf32, #tpu.memory_space<vmem>>, %arg2: memref<2x18xf32, #tpu.memory_space<vmem>>, %arg3: memref<2x1xf32, #tpu.memory_space<vmem>>, %arg4: memref<1x256xi32, #tpu.memory_space<vmem>>, %arg5: memref<1x256xi32, #tpu.memory_space<vmem>>, %arg6: memref<1x2x256xf32, #tpu.memory_space<vmem>>, %arg7: memref<18x256xf32, #tpu.memory_space<vmem>>) attributes {dimension_semantics = [#tpu.dimension_semantics<parallel>], iteration_bounds = array<i64: 2>, scalar_prefetch = 0 : i64, scratch_operands = 1 : i64, tpu.core_type = #tpu.core_type<tc>, window_params = [{transform_indices = @transform_0, window_bounds = array<i64: 1, 2, 256>}, {pipeline_mode = #tpu.pipeline_mode<synchronous>, transform_indices = @transform_1, window_bounds = array<i64: 2, 18>}, {pipeline_mode = #tpu.pipeline_mode<synchronous>, transform_indices = @transform_2, window_bounds = array<i64: 2, 1>}, {pipeline_mode = #tpu.pipeline_mode<synchronous>, transform_indices = @transform_3, window_bounds = array<i64: 1, 256>}, {pipeline_mode = #tpu.pipeline_mode<synchronous>, transform_indices = @transform_4, window_bounds = array<i64: 1, 256>}, {transform_indices = @transform_5, window_bounds = array<i64: 1, 2, 256>}]} {
    %c0 = arith.constant 0 : index
    %c0_0 = arith.constant 0 : index
    %c0_1 = arith.constant 0 : index
    %0 = vector.load %arg1[%c0, %c0_0, %c0_1] : memref<1x2x256xf32, #tpu.memory_space<vmem>>, vector<1x2x256xf32>
    %1 = vector.shape_cast %0 : vector<1x2x256xf32> to vector<2x256xf32>
    %c0_2 = arith.constant 0 : index
    %c0_3 = arith.constant 0 : index
    %2 = vector.load %arg4[%c0_2, %c0_3] : memref<1x256xi32, #tpu.memory_space<vmem>>, vector<1x256xi32>
    %c0_4 = arith.constant 0 : index
    %c0_5 = arith.constant 0 : index
    %3 = vector.load %arg5[%c0_4, %c0_5] : memref<1x256xi32, #tpu.memory_space<vmem>>, vector<1x256xi32>
    %c17_i32 = arith.constant 17 : i32
    %4 = tpu.dynamic_rotate %1 by %c17_i32 dim 1 : vector<2x256xf32>, i32 -> vector<2x256xf32>
    %c-1_i32 = arith.constant -1 : i32
    %5 = vector.broadcast %c-1_i32 : i32 to vector<1x256xi32>
    %6 = arith.addi %2, %5 : vector<1x256xi32>
    %c-1_i32_6 = arith.constant -1 : i32
    %7 = vector.broadcast %c-1_i32_6 : i32 to vector<1x256xi32>
    %8 = arith.addi %3, %7 : vector<1x256xi32>
    %c0_i32 = arith.constant 0 : i32
    %9 = vector.broadcast %c0_i32 : i32 to vector<1x256xi32>
    %10 = arith.cmpi sge, %6, %9 : vector<1x256xi32>
    %c16_i32 = arith.constant 16 : i32
    %11 = vector.broadcast %c16_i32 : i32 to vector<1x256xi32>
    %12 = arith.cmpi slt, %6, %11 : vector<1x256xi32>
    %13 = arith.andi %10, %12 : vector<1x256xi1>
    %c0_i32_7 = arith.constant 0 : i32
    %14 = vector.broadcast %c0_i32_7 : i32 to vector<1x256xi32>
    %15 = arith.cmpi sge, %8, %14 : vector<1x256xi32>
    %16 = arith.andi %13, %15 : vector<1x256xi1>
    %c16_i32_8 = arith.constant 16 : i32
    %17 = vector.broadcast %c16_i32_8 : i32 to vector<1x256xi32>
    %18 = arith.cmpi slt, %8, %17 : vector<1x256xi32>
    %19 = arith.andi %16, %18 : vector<1x256xi1>
    %20 = arith.extui %19 : vector<1x256xi1> to vector<1x256xi32>
    %21 = arith.sitofp %20 : vector<1x256xi32> to vector<1x256xf32>
    %22 = vector.broadcast %21 : vector<1x256xf32> to vector<2x256xf32>
    %23 = arith.mulf %4, %22 : vector<2x256xf32>
    %c0_9 = arith.constant 0 : index
    %c0_10 = arith.constant 0 : index
    %24 = vector.load %arg7[%c0_9, %c0_10] : memref<18x256xf32, #tpu.memory_space<vmem>>, vector<2x256xf32>
    tpu.vector_store %arg7[%c0_9, %c0_10], %23 {strides = array<i32>} : memref<18x256xf32, #tpu.memory_space<vmem>>, vector<2x256xf32>,
    %c16_i32_11 = arith.constant 16 : i32
    %25 = tpu.dynamic_rotate %1 by %c16_i32_11 dim 1 : vector<2x256xf32>, i32 -> vector<2x256xf32>
    %c-1_i32_12 = arith.constant -1 : i32
    %26 = vector.broadcast %c-1_i32_12 : i32 to vector<1x256xi32>
    %27 = arith.addi %2, %26 : vector<1x256xi32>
    %c0_i32_13 = arith.constant 0 : i32
    %28 = vector.broadcast %c0_i32_13 : i32 to vector<1x256xi32>
    %29 = arith.addi %3, %28 : vector<1x256xi32>
    %c0_i32_14 = arith.constant 0 : i32
    %30 = vector.broadcast %c0_i32_14 : i32 to vector<1x256xi32>
    %31 = arith.cmpi sge, %27, %30 : vector<1x256xi32>
    %c16_i32_15 = arith.constant 16 : i32
    %32 = vector.broadcast %c16_i32_15 : i32 to vector<1x256xi32>
    %33 = arith.cmpi slt, %27, %32 : vector<1x256xi32>
    %34 = arith.andi %31, %33 : vector<1x256xi1>
    %c0_i32_16 = arith.constant 0 : i32
    %35 = vector.broadcast %c0_i32_16 : i32 to vector<1x256xi32>
    %36 = arith.cmpi sge, %29, %35 : vector<1x256xi32>
    %37 = arith.andi %34, %36 : vector<1x256xi1>
    %c16_i32_17 = arith.constant 16 : i32
    %38 = vector.broadcast %c16_i32_17 : i32 to vector<1x256xi32>
    %39 = arith.cmpi slt, %29, %38 : vector<1x256xi32>
    %40 = arith.andi %37, %39 : vector<1x256xi1>
    %41 = arith.extui %40 : vector<1x256xi1> to vector<1x256xi32>
    %42 = arith.sitofp %41 : vector<1x256xi32> to vector<1x256xf32>
    %43 = vector.broadcast %42 : vector<1x256xf32> to vector<2x256xf32>
    %44 = arith.mulf %25, %43 : vector<2x256xf32>
    %c2 = arith.constant 2 : index
    %c0_18 = arith.constant 0 : index
    %45 = vector.load %arg7[%c2, %c0_18] : memref<18x256xf32, #tpu.memory_space<vmem>>, vector<2x256xf32>
    tpu.vector_store %arg7[%c2, %c0_18], %44 {strides = array<i32>} : memref<18x256xf32, #tpu.memory_space<vmem>>, vector<2x256xf32>,
    %c15_i32 = arith.constant 15 : i32
    %46 = tpu.dynamic_rotate %1 by %c15_i32 dim 1 : vector<2x256xf32>, i32 -> vector<2x256xf32>
    %c-1_i32_19 = arith.constant -1 : i32
    %47 = vector.broadcast %c-1_i32_19 : i32 to vector<1x256xi32>
    %48 = arith.addi %2, %47 : vector<1x256xi32>
    %c1_i32 = arith.constant 1 : i32
    %49 = vector.broadcast %c1_i32 : i32 to vector<1x256xi32>
    %50 = arith.addi %3, %49 : vector<1x256xi32>
    %c0_i32_20 = arith.constant 0 : i32
    %51 = vector.broadcast %c0_i32_20 : i32 to vector<1x256xi32>
    %52 = arith.cmpi sge, %48, %51 : vector<1x256xi32>
    %c16_i32_21 = arith.constant 16 : i32
    %53 = vector.broadcast %c16_i32_21 : i32 to vector<1x256xi32>
    %54 = arith.cmpi slt, %48, %53 : vector<1x256xi32>
    %55 = arith.andi %52, %54 : vector<1x256xi1>
    %c0_i32_22 = arith.constant 0 : i32
    %56 = vector.broadcast %c0_i32_22 : i32 to vector<1x256xi32>
    %57 = arith.cmpi sge, %50, %56 : vector<1x256xi32>
    %58 = arith.andi %55, %57 : vector<1x256xi1>
    %c16_i32_23 = arith.constant 16 : i32
    %59 = vector.broadcast %c16_i32_23 : i32 to vector<1x256xi32>
    %60 = arith.cmpi slt, %50, %59 : vector<1x256xi32>
    %61 = arith.andi %58, %60 : vector<1x256xi1>
    %62 = arith.extui %61 : vector<1x256xi1> to vector<1x256xi32>
    %63 = arith.sitofp %62 : vector<1x256xi32> to vector<1x256xf32>
    %64 = vector.broadcast %63 : vector<1x256xf32> to vector<2x256xf32>
    %65 = arith.mulf %46, %64 : vector<2x256xf32>
    %c4 = arith.constant 4 : index
    %c0_24 = arith.constant 0 : index
    %66 = vector.load %arg7[%c4, %c0_24] : memref<18x256xf32, #tpu.memory_space<vmem>>, vector<2x256xf32>
    tpu.vector_store %arg7[%c4, %c0_24], %65 {strides = array<i32>} : memref<18x256xf32, #tpu.memory_space<vmem>>, vector<2x256xf32>,
    %c1_i32_25 = arith.constant 1 : i32
    %67 = tpu.dynamic_rotate %1 by %c1_i32_25 dim 1 : vector<2x256xf32>, i32 -> vector<2x256xf32>
    %c0_i32_26 = arith.constant 0 : i32
    %68 = vector.broadcast %c0_i32_26 : i32 to vector<1x256xi32>
    %69 = arith.addi %2, %68 : vector<1x256xi32>
    %c-1_i32_27 = arith.constant -1 : i32
    %70 = vector.broadcast %c-1_i32_27 : i32 to vector<1x256xi32>
    %71 = arith.addi %3, %70 : vector<1x256xi32>
    %c0_i32_28 = arith.constant 0 : i32
    %72 = vector.broadcast %c0_i32_28 : i32 to vector<1x256xi32>
    %73 = arith.cmpi sge, %69, %72 : vector<1x256xi32>
    %c16_i32_29 = arith.constant 16 : i32
    %74 = vector.broadcast %c16_i32_29 : i32 to vector<1x256xi32>
    %75 = arith.cmpi slt, %69, %74 : vector<1x256xi32>
    %76 = arith.andi %73, %75 : vector<1x256xi1>
    %c0_i32_30 = arith.constant 0 : i32
    %77 = vector.broadcast %c0_i32_30 : i32 to vector<1x256xi32>
    %78 = arith.cmpi sge, %71, %77 : vector<1x256xi32>
    %79 = arith.andi %76, %78 : vector<1x256xi1>
    %c16_i32_31 = arith.constant 16 : i32
    %80 = vector.broadcast %c16_i32_31 : i32 to vector<1x256xi32>
    %81 = arith.cmpi slt, %71, %80 : vector<1x256xi32>
    %82 = arith.andi %79, %81 : vector<1x256xi1>
    %83 = arith.extui %82 : vector<1x256xi1> to vector<1x256xi32>
    %84 = arith.sitofp %83 : vector<1x256xi32> to vector<1x256xf32>
    %85 = vector.broadcast %84 : vector<1x256xf32> to vector<2x256xf32>
    %86 = arith.mulf %67, %85 : vector<2x256xf32>
    %c6 = arith.constant 6 : index
    %c0_32 = arith.constant 0 : index
    %87 = vector.load %arg7[%c6, %c0_32] : memref<18x256xf32, #tpu.memory_space<vmem>>, vector<2x256xf32>
    tpu.vector_store %arg7[%c6, %c0_32], %86 {strides = array<i32>} : memref<18x256xf32, #tpu.memory_space<vmem>>, vector<2x256xf32>,
    %c8 = arith.constant 8 : index
    %c0_33 = arith.constant 0 : index
    %88 = vector.load %arg7[%c8, %c0_33] : memref<18x256xf32, #tpu.memory_space<vmem>>, vector<2x256xf32>
    tpu.vector_store %arg7[%c8, %c0_33], %1 {strides = array<i32>} : memref<18x256xf32, #tpu.memory_space<vmem>>, vector<2x256xf32>,
    %c255_i32 = arith.constant 255 : i32
    %89 = tpu.dynamic_rotate %1 by %c255_i32 dim 1 : vector<2x256xf32>, i32 -> vector<2x256xf32>
    %c0_i32_34 = arith.constant 0 : i32
    %90 = vector.broadcast %c0_i32_34 : i32 to vector<1x256xi32>
    %91 = arith.addi %2, %90 : vector<1x256xi32>
    %c1_i32_35 = arith.constant 1 : i32
    %92 = vector.broadcast %c1_i32_35 : i32 to vector<1x256xi32>
    %93 = arith.addi %3, %92 : vector<1x256xi32>
    %c0_i32_36 = arith.constant 0 : i32
    %94 = vector.broadcast %c0_i32_36 : i32 to vector<1x256xi32>
    %95 = arith.cmpi sge, %91, %94 : vector<1x256xi32>
    %c16_i32_37 = arith.constant 16 : i32
    %96 = vector.broadcast %c16_i32_37 : i32 to vector<1x256xi32>
    %97 = arith.cmpi slt, %91, %96 : vector<1x256xi32>
    %98 = arith.andi %95, %97 : vector<1x256xi1>
    %c0_i32_38 = arith.constant 0 : i32
    %99 = vector.broadcast %c0_i32_38 : i32 to vector<1x256xi32>
    %100 = arith.cmpi sge, %93, %99 : vector<1x256xi32>
    %101 = arith.andi %98, %100 : vector<1x256xi1>
    %c16_i32_39 = arith.constant 16 : i32
    %102 = vector.broadcast %c16_i32_39 : i32 to vector<1x256xi32>
    %103 = arith.cmpi slt, %93, %102 : vector<1x256xi32>
    %104 = arith.andi %101, %103 : vector<1x256xi1>
    %105 = arith.extui %104 : vector<1x256xi1> to vector<1x256xi32>
    %106 = arith.sitofp %105 : vector<1x256xi32> to vector<1x256xf32>
    %107 = vector.broadcast %106 : vector<1x256xf32> to vector<2x256xf32>
    %108 = arith.mulf %89, %107 : vector<2x256xf32>
    %c10 = arith.constant 10 : index
    %c0_40 = arith.constant 0 : index
    %109 = vector.load %arg7[%c10, %c0_40] : memref<18x256xf32, #tpu.memory_space<vmem>>, vector<2x256xf32>
    tpu.vector_store %arg7[%c10, %c0_40], %108 {strides = array<i32>} : memref<18x256xf32, #tpu.memory_space<vmem>>, vector<2x256xf32>,
    %c241_i32 = arith.constant 241 : i32
    %110 = tpu.dynamic_rotate %1 by %c241_i32 dim 1 : vector<2x256xf32>, i32 -> vector<2x256xf32>
    %c1_i32_41 = arith.constant 1 : i32
    %111 = vector.broadcast %c1_i32_41 : i32 to vector<1x256xi32>
    %112 = arith.addi %2, %111 : vector<1x256xi32>
    %c-1_i32_42 = arith.constant -1 : i32
    %113 = vector.broadcast %c-1_i32_42 : i32 to vector<1x256xi32>
    %114 = arith.addi %3, %113 : vector<1x256xi32>
    %c0_i32_43 = arith.constant 0 : i32
    %115 = vector.broadcast %c0_i32_43 : i32 to vector<1x256xi32>
    %116 = arith.cmpi sge, %112, %115 : vector<1x256xi32>
    %c16_i32_44 = arith.constant 16 : i32
    %117 = vector.broadcast %c16_i32_44 : i32 to vector<1x256xi32>
    %118 = arith.cmpi slt, %112, %117 : vector<1x256xi32>
    %119 = arith.andi %116, %118 : vector<1x256xi1>
    %c0_i32_45 = arith.constant 0 : i32
    %120 = vector.broadcast %c0_i32_45 : i32 to vector<1x256xi32>
    %121 = arith.cmpi sge, %114, %120 : vector<1x256xi32>
    %122 = arith.andi %119, %121 : vector<1x256xi1>
    %c16_i32_46 = arith.constant 16 : i32
    %123 = vector.broadcast %c16_i32_46 : i32 to vector<1x256xi32>
    %124 = arith.cmpi slt, %114, %123 : vector<1x256xi32>
    %125 = arith.andi %122, %124 : vector<1x256xi1>
    %126 = arith.extui %125 : vector<1x256xi1> to vector<1x256xi32>
    %127 = arith.sitofp %126 : vector<1x256xi32> to vector<1x256xf32>
    %128 = vector.broadcast %127 : vector<1x256xf32> to vector<2x256xf32>
    %129 = arith.mulf %110, %128 : vector<2x256xf32>
    %c12 = arith.constant 12 : index
    %c0_47 = arith.constant 0 : index
    %130 = vector.load %arg7[%c12, %c0_47] : memref<18x256xf32, #tpu.memory_space<vmem>>, vector<2x256xf32>
    tpu.vector_store %arg7[%c12, %c0_47], %129 {strides = array<i32>} : memref<18x256xf32, #tpu.memory_space<vmem>>, vector<2x256xf32>,
    %c240_i32 = arith.constant 240 : i32
    %131 = tpu.dynamic_rotate %1 by %c240_i32 dim 1 : vector<2x256xf32>, i32 -> vector<2x256xf32>
    %c1_i32_48 = arith.constant 1 : i32
    %132 = vector.broadcast %c1_i32_48 : i32 to vector<1x256xi32>
    %133 = arith.addi %2, %132 : vector<1x256xi32>
    %c0_i32_49 = arith.constant 0 : i32
    %134 = vector.broadcast %c0_i32_49 : i32 to vector<1x256xi32>
    %135 = arith.addi %3, %134 : vector<1x256xi32>
    %c0_i32_50 = arith.constant 0 : i32
    %136 = vector.broadcast %c0_i32_50 : i32 to vector<1x256xi32>
    %137 = arith.cmpi sge, %133, %136 : vector<1x256xi32>
    %c16_i32_51 = arith.constant 16 : i32
    %138 = vector.broadcast %c16_i32_51 : i32 to vector<1x256xi32>
    %139 = arith.cmpi slt, %133, %138 : vector<1x256xi32>
    %140 = arith.andi %137, %139 : vector<1x256xi1>
    %c0_i32_52 = arith.constant 0 : i32
    %141 = vector.broadcast %c0_i32_52 : i32 to vector<1x256xi32>
    %142 = arith.cmpi sge, %135, %141 : vector<1x256xi32>
    %143 = arith.andi %140, %142 : vector<1x256xi1>
    %c16_i32_53 = arith.constant 16 : i32
    %144 = vector.broadcast %c16_i32_53 : i32 to vector<1x256xi32>
    %145 = arith.cmpi slt, %135, %144 : vector<1x256xi32>
    %146 = arith.andi %143, %145 : vector<1x256xi1>
    %147 = arith.extui %146 : vector<1x256xi1> to vector<1x256xi32>
    %148 = arith.sitofp %147 : vector<1x256xi32> to vector<1x256xf32>
    %149 = vector.broadcast %148 : vector<1x256xf32> to vector<2x256xf32>
    %150 = arith.mulf %131, %149 : vector<2x256xf32>
    %c14 = arith.constant 14 : index
    %c0_54 = arith.constant 0 : index
    %151 = vector.load %arg7[%c14, %c0_54] : memref<18x256xf32, #tpu.memory_space<vmem>>, vector<2x256xf32>
    tpu.vector_store %arg7[%c14, %c0_54], %150 {strides = array<i32>} : memref<18x256xf32, #tpu.memory_space<vmem>>, vector<2x256xf32>,
    %c239_i32 = arith.constant 239 : i32
    %152 = tpu.dynamic_rotate %1 by %c239_i32 dim 1 : vector<2x256xf32>, i32 -> vector<2x256xf32>
    %c1_i32_55 = arith.constant 1 : i32
    %153 = vector.broadcast %c1_i32_55 : i32 to vector<1x256xi32>
    %154 = arith.addi %2, %153 : vector<1x256xi32>
    %c1_i32_56 = arith.constant 1 : i32
    %155 = vector.broadcast %c1_i32_56 : i32 to vector<1x256xi32>
    %156 = arith.addi %3, %155 : vector<1x256xi32>
    %c0_i32_57 = arith.constant 0 : i32
    %157 = vector.broadcast %c0_i32_57 : i32 to vector<1x256xi32>
    %158 = arith.cmpi sge, %154, %157 : vector<1x256xi32>
    %c16_i32_58 = arith.constant 16 : i32
    %159 = vector.broadcast %c16_i32_58 : i32 to vector<1x256xi32>
    %160 = arith.cmpi slt, %154, %159 : vector<1x256xi32>
    %161 = arith.andi %158, %160 : vector<1x256xi1>
    %c0_i32_59 = arith.constant 0 : i32
    %162 = vector.broadcast %c0_i32_59 : i32 to vector<1x256xi32>
    %163 = arith.cmpi sge, %156, %162 : vector<1x256xi32>
    %164 = arith.andi %161, %163 : vector<1x256xi1>
    %c16_i32_60 = arith.constant 16 : i32
    %165 = vector.broadcast %c16_i32_60 : i32 to vector<1x256xi32>
    %166 = arith.cmpi slt, %156, %165 : vector<1x256xi32>
    %167 = arith.andi %164, %166 : vector<1x256xi1>
    %168 = arith.extui %167 : vector<1x256xi1> to vector<1x256xi32>
    %169 = arith.sitofp %168 : vector<1x256xi32> to vector<1x256xf32>
    %170 = vector.broadcast %169 : vector<1x256xf32> to vector<2x256xf32>
    %171 = arith.mulf %152, %170 : vector<2x256xf32>
    %c16 = arith.constant 16 : index
    %c0_61 = arith.constant 0 : index
    %172 = vector.load %arg7[%c16, %c0_61] : memref<18x256xf32, #tpu.memory_space<vmem>>, vector<2x256xf32>
    tpu.vector_store %arg7[%c16, %c0_61], %171 {strides = array<i32>} : memref<18x256xf32, #tpu.memory_space<vmem>>, vector<2x256xf32>,
    %c0_62 = arith.constant 0 : index
    %c0_63 = arith.constant 0 : index
    %173 = vector.load %arg2[%c0_62, %c0_63] : memref<2x18xf32, #tpu.memory_space<vmem>>, vector<2x18xf32>
    %c0_64 = arith.constant 0 : index
    %c0_65 = arith.constant 0 : index
    %174 = vector.load %arg7[%c0_64, %c0_65] : memref<18x256xf32, #tpu.memory_space<vmem>>, vector<18x256xf32>
    %cst = arith.constant dense<0.000000e+00> : vector<2x256xf32>
    %175 = tpu.matmul %173, %174, %cst {dimension_numbers = #tpu.dot_dimension_numbers<[1], [0], [0], [1], [0, 0, 1, 1], [], []>} : vector<2x18xf32>, vector<18x256xf32>, vector<2x256xf32> -> vector<2x256xf32>
    %c0_66 = arith.constant 0 : index
    %c0_67 = arith.constant 0 : index
    %176 = vector.load %arg3[%c0_66, %c0_67] : memref<2x1xf32, #tpu.memory_space<vmem>>, vector<2x1xf32>
    %177 = vector.broadcast %176 : vector<2x1xf32> to vector<2x256xf32>
    %178 = arith.addf %175, %177 : vector<2x256xf32>
    %179 = arith.negf %178 : vector<2x256xf32>
    %180 = math.exp %179 : vector<2x256xf32>
    %cst_68 = arith.constant 1.000000e+00 : f32
    %181 = vector.broadcast %cst_68 : f32 to vector<2x256xf32>
    %182 = arith.addf %181, %180 : vector<2x256xf32>
    %183 = arith.divf %181, %182 : vector<2x256xf32>
    %184 = arith.mulf %178, %183 : vector<2x256xf32>
    %c0_69 = arith.constant 0 : index
    %c0_70 = arith.constant 0 : index
    %c0_71 = arith.constant 0 : index
    %185 = vector.load %arg6[%c0_69, %c0_70, %c0_71] : memref<1x2x256xf32, #tpu.memory_space<vmem>>, vector<1x2x256xf32>
    %186 = vector.shape_cast %185 : vector<1x2x256xf32> to vector<2x256xf32>
    %187 = vector.shape_cast %184 : vector<2x256xf32> to vector<1x2x256xf32>
    tpu.vector_store %arg6[%c0_69, %c0_70, %c0_71], %187 {strides = array<i32>} : memref<1x2x256xf32, #tpu.memory_space<vmem>>, vector<1x2x256xf32>,
    return
  }
  func.func @transform_0(%arg0: i32) -> (i32, i32, i32) {
    %c0_i32 = arith.constant 0 : i32
    %c0_i32_0 = arith.constant 0 : i32
    %c0_i32_1 = arith.constant 0 : i32
    return %arg0, %c0_i32, %c0_i32_0 : i32, i32, i32
  }
  func.func @transform_1(%arg0: i32) -> (i32, i32) {
    %c0_i32 = arith.constant 0 : i32
    %c0_i32_0 = arith.constant 0 : i32
    %c0_i32_1 = arith.constant 0 : i32
    return %c0_i32, %c0_i32_0 : i32, i32
  }
  func.func @transform_2(%arg0: i32) -> (i32, i32) {
    %c0_i32 = arith.constant 0 : i32
    %c0_i32_0 = arith.constant 0 : i32
    %c0_i32_1 = arith.constant 0 : i32
    return %c0_i32, %c0_i32_0 : i32, i32
  }
  func.func @transform_3(%arg0: i32) -> (i32, i32) {
    %c0_i32 = arith.constant 0 : i32
    %c0_i32_0 = arith.constant 0 : i32
    %c0_i32_1 = arith.constant 0 : i32
    return %c0_i32, %c0_i32_0 : i32, i32
  }
  func.func @transform_4(%arg0: i32) -> (i32, i32) {
    %c0_i32 = arith.constant 0 : i32
    %c0_i32_0 = arith.constant 0 : i32
    %c0_i32_1 = arith.constant 0 : i32
    return %c0_i32, %c0_i32_0 : i32, i32
  }
  func.func @transform_5(%arg0: i32) -> (i32, i32, i32) {
    %c0_i32 = arith.constant 0 : i32
    %c0_i32_0 = arith.constant 0 : i32
    %c0_i32_1 = arith.constant 0 : i32
    return %arg0, %c0_i32, %c0_i32_0 : i32, i32, i32
  }
}

module attributes {stable_mosaic.version = 11 : i64} {
  func.func @kernel(%arg0: i32, %arg1: memref<1x2x256xf32, #tpu.memory_space<vmem>>, %arg2: memref<2x18xf32, #tpu.memory_space<vmem>>, %arg3: memref<2x1xf32, #tpu.memory_space<vmem>>, %arg4: memref<1x256xi32, #tpu.memory_space<vmem>>, %arg5: memref<1x256xi32, #tpu.memory_space<vmem>>, %arg6: memref<1x2x256xf32, #tpu.memory_space<vmem>>, %arg7: memref<18x256xf32, #tpu.memory_space<vmem>>) attributes {dimension_semantics = [#tpu.dimension_semantics<parallel>], iteration_bounds = array<i64: 2>, scalar_prefetch = 0 : i64, scratch_operands = 1 : i64, tpu.core_type = #tpu.core_type<tc>, window_params = [{transform_indices = @transform_0, window_bounds = array<i64: 1, 2, 256>}, {pipeline_mode = #tpu.pipeline_mode<synchronous>, transform_indices = @transform_1, window_bounds = array<i64: 2, 18>}, {pipeline_mode = #tpu.pipeline_mode<synchronous>, transform_indices = @transform_2, window_bounds = array<i64: 2, 1>}, {pipeline_mode = #tpu.pipeline_mode<synchronous>, transform_indices = @transform_3, window_bounds = array<i64: 1, 256>}, {pipeline_mode = #tpu.pipeline_mode<synchronous>, transform_indices = @transform_4, window_bounds = array<i64: 1, 256>}, {transform_indices = @transform_5, window_bounds = array<i64: 1, 2, 256>}]} {
    %c0 = arith.constant 0 : index
    %c0_0 = arith.constant 0 : index
    %c0_1 = arith.constant 0 : index
    %0 = vector.load %arg1[%c0, %c0_0, %c0_1] : memref<1x2x256xf32, #tpu.memory_space<vmem>>, vector<1x2x256xf32>
    %1 = vector.shape_cast %0 : vector<1x2x256xf32> to vector<2x256xf32>
    %c0_2 = arith.constant 0 : index
    %c0_3 = arith.constant 0 : index
    %2 = vector.load %arg4[%c0_2, %c0_3] : memref<1x256xi32, #tpu.memory_space<vmem>>, vector<1x256xi32>
    %c0_4 = arith.constant 0 : index
    %c0_5 = arith.constant 0 : index
    %3 = vector.load %arg5[%c0_4, %c0_5] : memref<1x256xi32, #tpu.memory_space<vmem>>, vector<1x256xi32>
    %c17_i32 = arith.constant 17 : i32
    %4 = tpu.dynamic_rotate %1 by %c17_i32 dim 1 : vector<2x256xf32>, i32 -> vector<2x256xf32>
    %c-1_i32 = arith.constant -1 : i32
    %5 = vector.broadcast %c-1_i32 : i32 to vector<1x256xi32>
    %6 = arith.addi %2, %5 : vector<1x256xi32>
    %c-1_i32_6 = arith.constant -1 : i32
    %7 = vector.broadcast %c-1_i32_6 : i32 to vector<1x256xi32>
    %8 = arith.addi %3, %7 : vector<1x256xi32>
    %c0_i32 = arith.constant 0 : i32
    %9 = vector.broadcast %c0_i32 : i32 to vector<1x256xi32>
    %10 = arith.cmpi sge, %6, %9 : vector<1x256xi32>
    %c16_i32 = arith.constant 16 : i32
    %11 = vector.broadcast %c16_i32 : i32 to vector<1x256xi32>
    %12 = arith.cmpi slt, %6, %11 : vector<1x256xi32>
    %13 = arith.andi %10, %12 : vector<1x256xi1>
    %c0_i32_7 = arith.constant 0 : i32
    %14 = vector.broadcast %c0_i32_7 : i32 to vector<1x256xi32>
    %15 = arith.cmpi sge, %8, %14 : vector<1x256xi32>
    %16 = arith.andi %13, %15 : vector<1x256xi1>
    %c16_i32_8 = arith.constant 16 : i32
    %17 = vector.broadcast %c16_i32_8 : i32 to vector<1x256xi32>
    %18 = arith.cmpi slt, %8, %17 : vector<1x256xi32>
    %19 = arith.andi %16, %18 : vector<1x256xi1>
    %20 = arith.extui %19 : vector<1x256xi1> to vector<1x256xi32>
    %21 = arith.sitofp %20 : vector<1x256xi32> to vector<1x256xf32>
    %22 = vector.broadcast %21 : vector<1x256xf32> to vector<2x256xf32>
    %23 = arith.mulf %4, %22 : vector<2x256xf32>
    %c0_9 = arith.constant 0 : index
    %c0_10 = arith.constant 0 : index
    %24 = vector.load %arg7[%c0_9, %c0_10] : memref<18x256xf32, #tpu.memory_space<vmem>>, vector<2x256xf32>
    tpu.vector_store %arg7[%c0_9, %c0_10], %23 {strides = array<i32>} : memref<18x256xf32, #tpu.memory_space<vmem>>, vector<2x256xf32>,
    %c16_i32_11 = arith.constant 16 : i32
    %25 = tpu.dynamic_rotate %1 by %c16_i32_11 dim 1 : vector<2x256xf32>, i32 -> vector<2x256xf32>
    %c-1_i32_12 = arith.constant -1 : i32
    %26 = vector.broadcast %c-1_i32_12 : i32 to vector<1x256xi32>
    %27 = arith.addi %2, %26 : vector<1x256xi32>
    %c0_i32_13 = arith.constant 0 : i32
    %28 = vector.broadcast %c0_i32_13 : i32 to vector<1x256xi32>
    %29 = arith.addi %3, %28 : vector<1x256xi32>
    %c0_i32_14 = arith.constant 0 : i32
    %30 = vector.broadcast %c0_i32_14 : i32 to vector<1x256xi32>
    %31 = arith.cmpi sge, %27, %30 : vector<1x256xi32>
    %c16_i32_15 = arith.constant 16 : i32
    %32 = vector.broadcast %c16_i32_15 : i32 to vector<1x256xi32>
    %33 = arith.cmpi slt, %27, %32 : vector<1x256xi32>
    %34 = arith.andi %31, %33 : vector<1x256xi1>
    %c0_i32_16 = arith.constant 0 : i32
    %35 = vector.broadcast %c0_i32_16 : i32 to vector<1x256xi32>
    %36 = arith.cmpi sge, %29, %35 : vector<1x256xi32>
    %37 = arith.andi %34, %36 : vector<1x256xi1>
    %c16_i32_17 = arith.constant 16 : i32
    %38 = vector.broadcast %c16_i32_17 : i32 to vector<1x256xi32>
    %39 = arith.cmpi slt, %29, %38 : vector<1x256xi32>
    %40 = arith.andi %37, %39 : vector<1x256xi1>
    %41 = arith.extui %40 : vector<1x256xi1> to vector<1x256xi32>
    %42 = arith.sitofp %41 : vector<1x256xi32> to vector<1x256xf32>
    %43 = vector.broadcast %42 : vector<1x256xf32> to vector<2x256xf32>
    %44 = arith.mulf %25, %43 : vector<2x256xf32>
    %c2 = arith.constant 2 : index
    %c0_18 = arith.constant 0 : index
    %45 = vector.load %arg7[%c2, %c0_18] : memref<18x256xf32, #tpu.memory_space<vmem>>, vector<2x256xf32>
    tpu.vector_store %arg7[%c2, %c0_18], %44 {strides = array<i32>} : memref<18x256xf32, #tpu.memory_space<vmem>>, vector<2x256xf32>,
    %c15_i32 = arith.constant 15 : i32
    %46 = tpu.dynamic_rotate %1 by %c15_i32 dim 1 : vector<2x256xf32>, i32 -> vector<2x256xf32>
    %c-1_i32_19 = arith.constant -1 : i32
    %47 = vector.broadcast %c-1_i32_19 : i32 to vector<1x256xi32>
    %48 = arith.addi %2, %47 : vector<1x256xi32>
    %c1_i32 = arith.constant 1 : i32
    %49 = vector.broadcast %c1_i32 : i32 to vector<1x256xi32>
    %50 = arith.addi %3, %49 : vector<1x256xi32>
    %c0_i32_20 = arith.constant 0 : i32
    %51 = vector.broadcast %c0_i32_20 : i32 to vector<1x256xi32>
    %52 = arith.cmpi sge, %48, %51 : vector<1x256xi32>
    %c16_i32_21 = arith.constant 16 : i32
    %53 = vector.broadcast %c16_i32_21 : i32 to vector<1x256xi32>
    %54 = arith.cmpi slt, %48, %53 : vector<1x256xi32>
    %55 = arith.andi %52, %54 : vector<1x256xi1>
    %c0_i32_22 = arith.constant 0 : i32
    %56 = vector.broadcast %c0_i32_22 : i32 to vector<1x256xi32>
    %57 = arith.cmpi sge, %50, %56 : vector<1x256xi32>
    %58 = arith.andi %55, %57 : vector<1x256xi1>
    %c16_i32_23 = arith.constant 16 : i32
    %59 = vector.broadcast %c16_i32_23 : i32 to vector<1x256xi32>
    %60 = arith.cmpi slt, %50, %59 : vector<1x256xi32>
    %61 = arith.andi %58, %60 : vector<1x256xi1>
    %62 = arith.extui %61 : vector<1x256xi1> to vector<1x256xi32>
    %63 = arith.sitofp %62 : vector<1x256xi32> to vector<1x256xf32>
    %64 = vector.broadcast %63 : vector<1x256xf32> to vector<2x256xf32>
    %65 = arith.mulf %46, %64 : vector<2x256xf32>
    %c4 = arith.constant 4 : index
    %c0_24 = arith.constant 0 : index
    %66 = vector.load %arg7[%c4, %c0_24] : memref<18x256xf32, #tpu.memory_space<vmem>>, vector<2x256xf32>
    tpu.vector_store %arg7[%c4, %c0_24], %65 {strides = array<i32>} : memref<18x256xf32, #tpu.memory_space<vmem>>, vector<2x256xf32>,
    %c1_i32_25 = arith.constant 1 : i32
    %67 = tpu.dynamic_rotate %1 by %c1_i32_25 dim 1 : vector<2x256xf32>, i32 -> vector<2x256xf32>
    %c0_i32_26 = arith.constant 0 : i32
    %68 = vector.broadcast %c0_i32_26 : i32 to vector<1x256xi32>
    %69 = arith.addi %2, %68 : vector<1x256xi32>
    %c-1_i32_27 = arith.constant -1 : i32
    %70 = vector.broadcast %c-1_i32_27 : i32 to vector<1x256xi32>
    %71 = arith.addi %3, %70 : vector<1x256xi32>
    %c0_i32_28 = arith.constant 0 : i32
    %72 = vector.broadcast %c0_i32_28 : i32 to vector<1x256xi32>
    %73 = arith.cmpi sge, %69, %72 : vector<1x256xi32>
    %c16_i32_29 = arith.constant 16 : i32
    %74 = vector.broadcast %c16_i32_29 : i32 to vector<1x256xi32>
    %75 = arith.cmpi slt, %69, %74 : vector<1x256xi32>
    %76 = arith.andi %73, %75 : vector<1x256xi1>
    %c0_i32_30 = arith.constant 0 : i32
    %77 = vector.broadcast %c0_i32_30 : i32 to vector<1x256xi32>
    %78 = arith.cmpi sge, %71, %77 : vector<1x256xi32>
    %79 = arith.andi %76, %78 : vector<1x256xi1>
    %c16_i32_31 = arith.constant 16 : i32
    %80 = vector.broadcast %c16_i32_31 : i32 to vector<1x256xi32>
    %81 = arith.cmpi slt, %71, %80 : vector<1x256xi32>
    %82 = arith.andi %79, %81 : vector<1x256xi1>
    %83 = arith.extui %82 : vector<1x256xi1> to vector<1x256xi32>
    %84 = arith.sitofp %83 : vector<1x256xi32> to vector<1x256xf32>
    %85 = vector.broadcast %84 : vector<1x256xf32> to vector<2x256xf32>
    %86 = arith.mulf %67, %85 : vector<2x256xf32>
    %c6 = arith.constant 6 : index
    %c0_32 = arith.constant 0 : index
    %87 = vector.load %arg7[%c6, %c0_32] : memref<18x256xf32, #tpu.memory_space<vmem>>, vector<2x256xf32>
    tpu.vector_store %arg7[%c6, %c0_32], %86 {strides = array<i32>} : memref<18x256xf32, #tpu.memory_space<vmem>>, vector<2x256xf32>,
    %c8 = arith.constant 8 : index
    %c0_33 = arith.constant 0 : index
    %88 = vector.load %arg7[%c8, %c0_33] : memref<18x256xf32, #tpu.memory_space<vmem>>, vector<2x256xf32>
    tpu.vector_store %arg7[%c8, %c0_33], %1 {strides = array<i32>} : memref<18x256xf32, #tpu.memory_space<vmem>>, vector<2x256xf32>,
    %c255_i32 = arith.constant 255 : i32
    %89 = tpu.dynamic_rotate %1 by %c255_i32 dim 1 : vector<2x256xf32>, i32 -> vector<2x256xf32>
    %c0_i32_34 = arith.constant 0 : i32
    %90 = vector.broadcast %c0_i32_34 : i32 to vector<1x256xi32>
    %91 = arith.addi %2, %90 : vector<1x256xi32>
    %c1_i32_35 = arith.constant 1 : i32
    %92 = vector.broadcast %c1_i32_35 : i32 to vector<1x256xi32>
    %93 = arith.addi %3, %92 : vector<1x256xi32>
    %c0_i32_36 = arith.constant 0 : i32
    %94 = vector.broadcast %c0_i32_36 : i32 to vector<1x256xi32>
    %95 = arith.cmpi sge, %91, %94 : vector<1x256xi32>
    %c16_i32_37 = arith.constant 16 : i32
    %96 = vector.broadcast %c16_i32_37 : i32 to vector<1x256xi32>
    %97 = arith.cmpi slt, %91, %96 : vector<1x256xi32>
    %98 = arith.andi %95, %97 : vector<1x256xi1>
    %c0_i32_38 = arith.constant 0 : i32
    %99 = vector.broadcast %c0_i32_38 : i32 to vector<1x256xi32>
    %100 = arith.cmpi sge, %93, %99 : vector<1x256xi32>
    %101 = arith.andi %98, %100 : vector<1x256xi1>
    %c16_i32_39 = arith.constant 16 : i32
    %102 = vector.broadcast %c16_i32_39 : i32 to vector<1x256xi32>
    %103 = arith.cmpi slt, %93, %102 : vector<1x256xi32>
    %104 = arith.andi %101, %103 : vector<1x256xi1>
    %105 = arith.extui %104 : vector<1x256xi1> to vector<1x256xi32>
    %106 = arith.sitofp %105 : vector<1x256xi32> to vector<1x256xf32>
    %107 = vector.broadcast %106 : vector<1x256xf32> to vector<2x256xf32>
    %108 = arith.mulf %89, %107 : vector<2x256xf32>
    %c10 = arith.constant 10 : index
    %c0_40 = arith.constant 0 : index
    %109 = vector.load %arg7[%c10, %c0_40] : memref<18x256xf32, #tpu.memory_space<vmem>>, vector<2x256xf32>
    tpu.vector_store %arg7[%c10, %c0_40], %108 {strides = array<i32>} : memref<18x256xf32, #tpu.memory_space<vmem>>, vector<2x256xf32>,
    %c241_i32 = arith.constant 241 : i32
    %110 = tpu.dynamic_rotate %1 by %c241_i32 dim 1 : vector<2x256xf32>, i32 -> vector<2x256xf32>
    %c1_i32_41 = arith.constant 1 : i32
    %111 = vector.broadcast %c1_i32_41 : i32 to vector<1x256xi32>
    %112 = arith.addi %2, %111 : vector<1x256xi32>
    %c-1_i32_42 = arith.constant -1 : i32
    %113 = vector.broadcast %c-1_i32_42 : i32 to vector<1x256xi32>
    %114 = arith.addi %3, %113 : vector<1x256xi32>
    %c0_i32_43 = arith.constant 0 : i32
    %115 = vector.broadcast %c0_i32_43 : i32 to vector<1x256xi32>
    %116 = arith.cmpi sge, %112, %115 : vector<1x256xi32>
    %c16_i32_44 = arith.constant 16 : i32
    %117 = vector.broadcast %c16_i32_44 : i32 to vector<1x256xi32>
    %118 = arith.cmpi slt, %112, %117 : vector<1x256xi32>
    %119 = arith.andi %116, %118 : vector<1x256xi1>
    %c0_i32_45 = arith.constant 0 : i32
    %120 = vector.broadcast %c0_i32_45 : i32 to vector<1x256xi32>
    %121 = arith.cmpi sge, %114, %120 : vector<1x256xi32>
    %122 = arith.andi %119, %121 : vector<1x256xi1>
    %c16_i32_46 = arith.constant 16 : i32
    %123 = vector.broadcast %c16_i32_46 : i32 to vector<1x256xi32>
    %124 = arith.cmpi slt, %114, %123 : vector<1x256xi32>
    %125 = arith.andi %122, %124 : vector<1x256xi1>
    %126 = arith.extui %125 : vector<1x256xi1> to vector<1x256xi32>
    %127 = arith.sitofp %126 : vector<1x256xi32> to vector<1x256xf32>
    %128 = vector.broadcast %127 : vector<1x256xf32> to vector<2x256xf32>
    %129 = arith.mulf %110, %128 : vector<2x256xf32>
    %c12 = arith.constant 12 : index
    %c0_47 = arith.constant 0 : index
    %130 = vector.load %arg7[%c12, %c0_47] : memref<18x256xf32, #tpu.memory_space<vmem>>, vector<2x256xf32>
    tpu.vector_store %arg7[%c12, %c0_47], %129 {strides = array<i32>} : memref<18x256xf32, #tpu.memory_space<vmem>>, vector<2x256xf32>,
    %c240_i32 = arith.constant 240 : i32
    %131 = tpu.dynamic_rotate %1 by %c240_i32 dim 1 : vector<2x256xf32>, i32 -> vector<2x256xf32>
    %c1_i32_48 = arith.constant 1 : i32
    %132 = vector.broadcast %c1_i32_48 : i32 to vector<1x256xi32>
    %133 = arith.addi %2, %132 : vector<1x256xi32>
    %c0_i32_49 = arith.constant 0 : i32
    %134 = vector.broadcast %c0_i32_49 : i32 to vector<1x256xi32>
    %135 = arith.addi %3, %134 : vector<1x256xi32>
    %c0_i32_50 = arith.constant 0 : i32
    %136 = vector.broadcast %c0_i32_50 : i32 to vector<1x256xi32>
    %137 = arith.cmpi sge, %133, %136 : vector<1x256xi32>
    %c16_i32_51 = arith.constant 16 : i32
    %138 = vector.broadcast %c16_i32_51 : i32 to vector<1x256xi32>
    %139 = arith.cmpi slt, %133, %138 : vector<1x256xi32>
    %140 = arith.andi %137, %139 : vector<1x256xi1>
    %c0_i32_52 = arith.constant 0 : i32
    %141 = vector.broadcast %c0_i32_52 : i32 to vector<1x256xi32>
    %142 = arith.cmpi sge, %135, %141 : vector<1x256xi32>
    %143 = arith.andi %140, %142 : vector<1x256xi1>
    %c16_i32_53 = arith.constant 16 : i32
    %144 = vector.broadcast %c16_i32_53 : i32 to vector<1x256xi32>
    %145 = arith.cmpi slt, %135, %144 : vector<1x256xi32>
    %146 = arith.andi %143, %145 : vector<1x256xi1>
    %147 = arith.extui %146 : vector<1x256xi1> to vector<1x256xi32>
    %148 = arith.sitofp %147 : vector<1x256xi32> to vector<1x256xf32>
    %149 = vector.broadcast %148 : vector<1x256xf32> to vector<2x256xf32>
    %150 = arith.mulf %131, %149 : vector<2x256xf32>
    %c14 = arith.constant 14 : index
    %c0_54 = arith.constant 0 : index
    %151 = vector.load %arg7[%c14, %c0_54] : memref<18x256xf32, #tpu.memory_space<vmem>>, vector<2x256xf32>
    tpu.vector_store %arg7[%c14, %c0_54], %150 {strides = array<i32>} : memref<18x256xf32, #tpu.memory_space<vmem>>, vector<2x256xf32>,
    %c239_i32 = arith.constant 239 : i32
    %152 = tpu.dynamic_rotate %1 by %c239_i32 dim 1 : vector<2x256xf32>, i32 -> vector<2x256xf32>
    %c1_i32_55 = arith.constant 1 : i32
    %153 = vector.broadcast %c1_i32_55 : i32 to vector<1x256xi32>
    %154 = arith.addi %2, %153 : vector<1x256xi32>
    %c1_i32_56 = arith.constant 1 : i32
    %155 = vector.broadcast %c1_i32_56 : i32 to vector<1x256xi32>
    %156 = arith.addi %3, %155 : vector<1x256xi32>
    %c0_i32_57 = arith.constant 0 : i32
    %157 = vector.broadcast %c0_i32_57 : i32 to vector<1x256xi32>
    %158 = arith.cmpi sge, %154, %157 : vector<1x256xi32>
    %c16_i32_58 = arith.constant 16 : i32
    %159 = vector.broadcast %c16_i32_58 : i32 to vector<1x256xi32>
    %160 = arith.cmpi slt, %154, %159 : vector<1x256xi32>
    %161 = arith.andi %158, %160 : vector<1x256xi1>
    %c0_i32_59 = arith.constant 0 : i32
    %162 = vector.broadcast %c0_i32_59 : i32 to vector<1x256xi32>
    %163 = arith.cmpi sge, %156, %162 : vector<1x256xi32>
    %164 = arith.andi %161, %163 : vector<1x256xi1>
    %c16_i32_60 = arith.constant 16 : i32
    %165 = vector.broadcast %c16_i32_60 : i32 to vector<1x256xi32>
    %166 = arith.cmpi slt, %156, %165 : vector<1x256xi32>
    %167 = arith.andi %164, %166 : vector<1x256xi1>
    %168 = arith.extui %167 : vector<1x256xi1> to vector<1x256xi32>
    %169 = arith.sitofp %168 : vector<1x256xi32> to vector<1x256xf32>
    %170 = vector.broadcast %169 : vector<1x256xf32> to vector<2x256xf32>
    %171 = arith.mulf %152, %170 : vector<2x256xf32>
    %c16 = arith.constant 16 : index
    %c0_61 = arith.constant 0 : index
    %172 = vector.load %arg7[%c16, %c0_61] : memref<18x256xf32, #tpu.memory_space<vmem>>, vector<2x256xf32>
    tpu.vector_store %arg7[%c16, %c0_61], %171 {strides = array<i32>} : memref<18x256xf32, #tpu.memory_space<vmem>>, vector<2x256xf32>,
    %c0_62 = arith.constant 0 : index
    %c0_63 = arith.constant 0 : index
    %173 = vector.load %arg2[%c0_62, %c0_63] : memref<2x18xf32, #tpu.memory_space<vmem>>, vector<2x18xf32>
    %c0_64 = arith.constant 0 : index
    %c0_65 = arith.constant 0 : index
    %174 = vector.load %arg7[%c0_64, %c0_65] : memref<18x256xf32, #tpu.memory_space<vmem>>, vector<18x256xf32>
    %cst = arith.constant dense<0.000000e+00> : vector<2x256xf32>
    %175 = tpu.matmul %173, %174, %cst {dimension_numbers = #tpu.dot_dimension_numbers<[1], [0], [0], [1], [0, 0, 1, 1], [], []>} : vector<2x18xf32>, vector<18x256xf32>, vector<2x256xf32> -> vector<2x256xf32>
    %c0_66 = arith.constant 0 : index
    %c0_67 = arith.constant 0 : index
    %176 = vector.load %arg3[%c0_66, %c0_67] : memref<2x1xf32, #tpu.memory_space<vmem>>, vector<2x1xf32>
    %177 = vector.broadcast %176 : vector<2x1xf32> to vector<2x256xf32>
    %178 = arith.addf %175, %177 : vector<2x256xf32>
    %179 = arith.negf %178 : vector<2x256xf32>
    %180 = math.exp %179 : vector<2x256xf32>
    %cst_68 = arith.constant 1.000000e+00 : f32
    %181 = vector.broadcast %cst_68 : f32 to vector<2x256xf32>
    %182 = arith.addf %181, %180 : vector<2x256xf32>
    %183 = arith.divf %181, %182 : vector<2x256xf32>
    %184 = arith.mulf %178, %183 : vector<2x256xf32>
    %cst_69 = arith.constant dense<0.000000e+00> : vector<2xf32>
    %185 = vector.multi_reduction <add>, %184, %cst_69 [1] : vector<2x256xf32> to vector<2xf32>
    %186 = vector.shape_cast %185 : vector<2xf32> to vector<2x1xf32>
    %cst_70 = arith.constant 2.560000e+02 : f32
    %187 = vector.broadcast %cst_70 : f32 to vector<2x1xf32>
    %188 = arith.divf %186, %187 : vector<2x1xf32>
    %189 = vector.broadcast %188 : vector<2x1xf32> to vector<2x256xf32>
    %190 = arith.subf %184, %189 : vector<2x256xf32>
    %191 = vector.broadcast %188 : vector<2x1xf32> to vector<2x256xf32>
    %192 = arith.subf %184, %191 : vector<2x256xf32>
    %193 = arith.mulf %190, %192 : vector<2x256xf32>
    %cst_71 = arith.constant dense<0.000000e+00> : vector<2xf32>
    %194 = vector.multi_reduction <add>, %193, %cst_71 [1] : vector<2x256xf32> to vector<2xf32>
    %195 = vector.shape_cast %194 : vector<2xf32> to vector<2x1xf32>
    %cst_72 = arith.constant 0.00392156886 : f32
    %196 = vector.broadcast %cst_72 : f32 to vector<2x1xf32>
    %197 = arith.mulf %195, %196 : vector<2x1xf32>
    %cst_73 = arith.constant 9.99999974E-5 : f32
    %198 = vector.broadcast %cst_73 : f32 to vector<2x1xf32>
    %199 = arith.addf %197, %198 : vector<2x1xf32>
    %cst_74 = arith.constant 4.000000e+00 : f32
    %200 = vector.broadcast %cst_74 : f32 to vector<2x1xf32>
    %201 = arith.mulf %200, %199 : vector<2x1xf32>
    %202 = tpu.reciprocal %201 {approx = true} : vector<2x1xf32> -> vector<2x1xf32>
    %203 = vector.broadcast %202 : vector<2x1xf32> to vector<2x256xf32>
    %204 = arith.mulf %193, %203 : vector<2x256xf32>
    %cst_75 = arith.constant 5.000000e-01 : f32
    %205 = vector.broadcast %cst_75 : f32 to vector<2x256xf32>
    %206 = arith.addf %204, %205 : vector<2x256xf32>
    %207 = arith.negf %206 : vector<2x256xf32>
    %208 = math.exp %207 : vector<2x256xf32>
    %cst_76 = arith.constant 1.000000e+00 : f32
    %209 = vector.broadcast %cst_76 : f32 to vector<2x256xf32>
    %210 = arith.addf %209, %208 : vector<2x256xf32>
    %211 = arith.divf %209, %210 : vector<2x256xf32>
    %212 = arith.mulf %184, %211 : vector<2x256xf32>
    %c0_77 = arith.constant 0 : index
    %c0_78 = arith.constant 0 : index
    %c0_79 = arith.constant 0 : index
    %213 = vector.load %arg6[%c0_77, %c0_78, %c0_79] : memref<1x2x256xf32, #tpu.memory_space<vmem>>, vector<1x2x256xf32>
    %214 = vector.shape_cast %213 : vector<1x2x256xf32> to vector<2x256xf32>
    %215 = vector.shape_cast %212 : vector<2x256xf32> to vector<1x2x256xf32>
    tpu.vector_store %arg6[%c0_77, %c0_78, %c0_79], %215 {strides = array<i32>} : memref<1x2x256xf32, #tpu.memory_space<vmem>>, vector<1x2x256xf32>,
    return
  }
  func.func @transform_0(%arg0: i32) -> (i32, i32, i32) {
    %c0_i32 = arith.constant 0 : i32
    %c0_i32_0 = arith.constant 0 : i32
    %c0_i32_1 = arith.constant 0 : i32
    return %arg0, %c0_i32, %c0_i32_0 : i32, i32, i32
  }
  func.func @transform_1(%arg0: i32) -> (i32, i32) {
    %c0_i32 = arith.constant 0 : i32
    %c0_i32_0 = arith.constant 0 : i32
    %c0_i32_1 = arith.constant 0 : i32
    return %c0_i32, %c0_i32_0 : i32, i32
  }
  func.func @transform_2(%arg0: i32) -> (i32, i32) {
    %c0_i32 = arith.constant 0 : i32
    %c0_i32_0 = arith.constant 0 : i32
    %c0_i32_1 = arith.constant 0 : i32
    return %c0_i32, %c0_i32_0 : i32, i32
  }
  func.func @transform_3(%arg0: i32) -> (i32, i32) {
    %c0_i32 = arith.constant 0 : i32
    %c0_i32_0 = arith.constant 0 : i32
    %c0_i32_1 = arith.constant 0 : i32
    return %c0_i32, %c0_i32_0 : i32, i32
  }
  func.func @transform_4(%arg0: i32) -> (i32, i32) {
    %c0_i32 = arith.constant 0 : i32
    %c0_i32_0 = arith.constant 0 : i32
    %c0_i32_1 = arith.constant 0 : i32
    return %c0_i32, %c0_i32_0 : i32, i32
  }
  func.func @transform_5(%arg0: i32) -> (i32, i32, i32) {
    %c0_i32 = arith.constant 0 : i32
    %c0_i32_0 = arith.constant 0 : i32
    %c0_i32_1 = arith.constant 0 : i32
    return %arg0, %c0_i32, %c0_i32_0 : i32, i32, i32
  }
}

</mosaic_0001>

<bundles_post_ra>
// kernel: c2f_simam_forward.4
= control target key start
LH: loop header
LB: loop body
LE: loop exit
PB: predicated region body
PF: predicated region fallthrough
CT: control target
= control target key end

     0   :  { %s808_s21 = smov 0   ;;  %s810_s22 = smov 0   ;;  %s860_s0 = inlined_call_operand.vmem [shape: f32[2,4,256], index: 0, kind: input, shape index: {}]   ;;  %s861_s1 = inlined_call_operand.vmem [shape: f32[2,4], index: 1, kind: input, shape index: {}]   ;;  %s862_s2 = inlined_call_operand.vmem [shape: f32[2,4], index: 2, kind: input, shape index: {}]   ;;  %s863_s3 = inlined_call_operand.vmem [shape: f32[2,1], index: 3, kind: input, shape index: {}]   ;;  %s864_s4 = inlined_call_operand.vmem [shape: f32[2,1], index: 4, kind: input, shape index: {}]   ;;  %s865_s5 = inlined_call_operand.vmem [shape: f32[2,2,256], index: 5, kind: output, shape index: {0}]   ;;  %s866_s6 = inlined_call_operand.vmem [shape: f32[2,2,256], index: 6, kind: output, shape index: {1}]  }
   0x1   :  { %s812_s23 = smov 0  }
   0x2 LB: > { %s29_s24 = sadd.s32 1, %s765_s22  ;;  %p679_p0 = scmp.ge.s32.totalorder %s769_s23, 1  ;;  %s769_s23 = sphi %s812_s23, %s17_s23   ;;  %s765_s22 = sphi %s810_s22, %s868_s22   ;;  %s761_s21 = sphi %s808_s21, %s867_s21  }
   0x3   : > { %p31_p1 = scmp.ge.s32.totalorder %s29_s24, 2  ;;  %p238_p2 = scmp.lt.s32.totalorder %s769_s23, 3 }
   0x5   : > { %s870_s24 = smov (%p31_p1, %s29_s24), 0  ;;  %p239_p3 = pnand %p679_p0, %p238_p2 }
   0x6   : > { %p286_p4 = scmp.lt.s32.totalorder (!%p239_p3), %s761_s21, 1  ;;  %v771_v0 = vmov (!%p239_p3), 0.0   ;;  %v317_v1 = vld [vmem:[%s863_s3] sm:$0x3] (!%p239_p3)  ;;  %v772_v2 = vmov (!%p239_p3), 0   ;;  %vm329_vm0 = vcmask (!%p239_p3), 1043456  }
   0x7   : > { %242 = sbr.rel (%p239_p3) target bundleno = 270 (0x10e), region = 40  ;;  %398 = vmatprep.mubr.f32.mxu0 (!%p239_p3), %v771_v0  ;;  %505 = vmatprep.mubr.f32.mxu1 (!%p239_p3), %v771_v0  ;;  %v432_v3 = vld [vmem:[%s864_s4] sm:$0x3] (!%p239_p3)  ;;  %vm325_vm1 = vcmask (!%p239_p3), 31744  }
   0x8   : > { %729 = vset.pattern.permute.xlu0 (!%p239_p3), %v772_v2  ;;  %v316_v6 = vld [vmem:[%s861_s1] sm:$0x3] (!%p239_p3) }
   0x9   : > { %320 = vperm.xlu0 (!%p239_p3), %729, %v317_v1   ;;  %v431_v7 = vld [vmem:[%s862_s2] sm:$0x3] (!%p239_p3) }
   0xd   : > { %435 = vperm.xlu0 (!%p239_p3), %729, %v432_v3  }
   0xe   : > { %s872_s21 = smov (!%p286_p4, %s761_s21), 1 }
   0xf   : > { %s700_s27 = sshll.u32 %s872_s21, 3  ;;  %s701_s13 = sshll.u32 %s872_s21, 2 }
  0x10   : > { %s293_s8 = scalar_lea.vmem %s860_s0, %s700_s27  ;;  %s303_s16 = scalar_lea.vmem %s865_s5, %s701_s13 }
  0x11   : > { %v315_v4 = vld [vmem:[%s293_s8] sm:$0xff]  ;;  %s313_s19 = scalar_lea.vmem %s866_s6, %s701_s13 }
  0x12   : > { %v324_v5 = vcombine.high %v315_v4, %v315_v4 }
  0x14   : > { %686 = vmatprep.subr.msk.mxu0 %vm329_vm0, %v324_v5  ;;  %692 = vmatprep.subr.msk.mxu1 %vm329_vm0, %v324_v5 }
  0x15   : > { %687 = vmatpush1.msk.msra.mxu0 %vm329_vm0, %v315_v4  ;;  %693 = vmatpush1.msk.msra.mxu1 %vm329_vm0, %v315_v4 }
  0x16   : > { %688 = vmatmul.mubr.msk.f32.vlgmr.msra.gmra.mrb[0].mxu0 %vm325_vm1, %v316_v6  ;;  %694 = vmatmul.mubr.msk.f32.vlgmr.msra.gmra.mrb[0].mxu1 %vm325_vm1, %v431_v7 }
  0x88   : > { %v321_v8 = vpop.permute.xlu0 %320 }
  0x8c   : > { %v436_v9 = vpop.permute.xlu0 %435 }
  0xe9   : > { %v400_v10 = vpop.f32.mrb[0].mxu0  ;;  %v507_v11 = vpop.f32.mrb[0].mxu1 }
  0xea   : > { %v401_v12 = vadd.f32 %v400_v10, %v321_v8  ;;  %v508_v13 = vadd.f32 %v507_v11, %v436_v9  ;;  %v402_v14 = vpop.f32.mrb[1].mxu0  ;;  %v509_v15 = vpop.f32.mrb[1].mxu1 }
  0xeb   : > { %v403_v16 = vadd.f32 %v402_v14, %v321_v8  ;;  %v510_v17 = vadd.f32 %v509_v15, %v436_v9 }
  0xec   : > { %v689_v18 = vmul.f32 -1.442695, %v401_v12  ;;  %v695_v19 = vmul.f32 -1.442695, %v508_v13 }
  0xed   : > { %v690_v20 = vmul.f32 -1.442695, %v403_v16  ;;  %v696_v21 = vmul.f32 -1.442695, %v510_v17 }
  0xee   : > { %731 = vpow2.f32 %v689_v18 }
  0xef   : > { %733 = vpow2.f32 %v695_v19 }
  0xf0   : > { %735 = vpow2.f32 %v690_v20 }
  0xf1   : > { %737 = vpow2.f32 %v696_v21 }
  0xf8   : > { %v732_v22 = vpop.eup %731 }
  0xf9   : > { %v734_v23 = vpop.eup %733  ;;  %v411_v24 = vadd.f32 1.0, %v732_v22 }
  0xfa   : > { %v736_v25 = vpop.eup %735  ;;  %v518_v26 = vadd.f32 1.0, %v734_v23 }
  0xfb   : > { %v738_v27 = vpop.eup %737  ;;  %739 = vrcp.f32 %v411_v24  ;;  %v412_v28 = vadd.f32 1.0, %v736_v25 }
  0xfc   : > { %741 = vrcp.f32 %v518_v26  ;;  %v519_v29 = vadd.f32 1.0, %v738_v27 }
  0xfd   : > { %743 = vrcp.f32 %v412_v28 }
  0xfe   : > { %745 = vrcp.f32 %v519_v29 }
 0x105   : > { %v740_v30 = vpop.eup %739 }
 0x106   : > { %v742_v31 = vpop.eup %741  ;;  %v417_v32 = vmul.f32 %v740_v30, %v401_v12 }
 0x107   : > { %v744_v33 = vpop.eup %743  ;;  %v524_v34 = vmul.f32 %v742_v31, %v508_v13 }
 0x108   : > { %v746_v35 = vpop.eup %745  ;;  %v418_v36 = vmul.f32 %v744_v33, %v403_v16 }
 0x109   : > { %v525_v37 = vmul.f32 %v746_v35, %v510_v17 }
 0x10a   : > { %v421_v38 = vcombine.low %v417_v32, %v418_v36 }
 0x10b   : > { %v528_v39 = vcombine.low %v524_v34, %v525_v37 }
 0x10c   : > { %691 = vst.sshfl [vmem:[%s303_s16] sm:$0x33 pattern:$0x76325410] %v421_v38 }
 0x10d   : > { %697 = vst.sshfl [vmem:[%s313_s19] sm:$0x33 pattern:$0x76325410] %v528_v39 }
 0x10e PF: > { %s17_s23 = sadd.s32 1, %s769_s23   ;;  %s867_s21 = smov %s765_s22 }
 0x10f   : > { %p14_p5 = scmp.ge.s32.totalorder %s17_s23, 4   ;;  %s868_s22 = smov %s870_s24 }
 0x111   :  { %16 = sbr.rel (!%p14_p5) target bundleno = 2 (0x2), region = 82 }

// kernel: c2f_simam_forward.7
= control target key start
LH: loop header
LB: loop body
LE: loop exit
PB: predicated region body
PF: predicated region fallthrough
CT: control target
= control target key end

     0   :  { %s733_s18 = smov 0   ;;  %s735_s19 = smov 0   ;;  %s782_s0 = inlined_call_operand.vmem [shape: f32[2,2,256], index: 0, kind: input, shape index: {}]   ;;  %s783_s1 = inlined_call_operand.vmem [shape: f32[2,2,256], index: 1, kind: input, shape index: {}]   ;;  %s784_s2 = inlined_call_operand.vmem [shape: f32[2,2,256], index: 2, kind: input, shape index: {}]   ;;  %s785_s3 = inlined_call_operand.vmem [shape: f32[4,6], index: 3, kind: input, shape index: {}]   ;;  %s786_s4 = inlined_call_operand.vmem [shape: f32[4,1], index: 4, kind: input, shape index: {}]   ;;  %s787_s5 = inlined_call_operand.vmem [shape: f32[2,4,256], index: 5, kind: output, shape index: {}]  }
   0x1   :  { %s737_s20 = smov 0  }
   0x2 LB: > { %s27_s21 = sadd.s32 1, %s694_s19  ;;  %p616_p0 = scmp.ge.s32.totalorder %s698_s20, 1  ;;  %s698_s20 = sphi %s737_s20, %s15_s20   ;;  %s694_s19 = sphi %s735_s19, %s789_s19   ;;  %s690_s18 = sphi %s733_s18, %s788_s18  }
   0x3   : > { %p29_p1 = scmp.ge.s32.totalorder %s27_s21, 2  ;;  %p242_p2 = scmp.lt.s32.totalorder %s698_s20, 3 }
   0x5   : > { %s791_s21 = smov (%p29_p1, %s27_s21), 0  ;;  %p243_p3 = pnand %p616_p0, %p242_p2 }
   0x6   : > { %p297_p4 = scmp.lt.s32.totalorder (!%p243_p3), %s690_s18, 1  ;;  %v356_v0 = vlaneseq (!%p243_p3)  ;;  %v700_v1 = vmov (!%p243_p3), 1983009808   ;;  %v701_v3 = vmov (!%p243_p3), 0.0   ;;  %v382_v4 = vld [vmem:[%s786_s4] sm:$0xf] (!%p243_p3) }
   0x7   : > { %246 = sbr.rel (%p243_p3) target bundleno = 279 (0x117), region = 40  ;;  %v354_v2 = vunpack.c.l.s4 (!%p243_p3), %v700_v1  ;;  %463 = vmatprep.mubr.f32.mxu0 (!%p243_p3), %v701_v3  ;;  %v702_v6 = vmov (!%p243_p3), 0   ;;  %vm392_vm0 = vcmask (!%p243_p3), 1045504   ;;  %v381_v18 = vld [vmem:[%s785_s3] sm:$0xf] (!%p243_p3)  ;;  %vm388_vm1 = vcmask (!%p243_p3), 48128  }
   0x8   : > { %v357_v5 = vshrl.u32 (!%p243_p3), %v356_v0, 7  ;;  %666 = vset.pattern.permute.xlu0 (!%p243_p3), %v702_v6 }
   0x9   : > { %v355_v7 = vunpack.c.0.s8 (!%p243_p3), %v354_v2  ;;  %385 = vperm.xlu0 (!%p243_p3), %666, %v382_v4  }
   0xb   : > { %v358_v8 = vsub.s32 (!%p243_p3), %v355_v7, %v357_v5 }
   0xe   : > { %s793_s18 = smov (!%p297_p4, %s690_s18), 1 }
   0xf   : > { %s635_s24 = sshll.u32 %s793_s18, 2  ;;  %s638_s11 = sshll.u32 %s793_s18, 3 }
  0x10   : > { %s304_s27 = scalar_lea.vmem %s782_s0, %s635_s24  ;;  %s314_s30 = scalar_lea.vmem %s783_s1, %s635_s24 }
  0x11   : > { %s324_s8 = scalar_lea.vmem %s784_s2, %s635_s24  ;;  %v625_v9 = vld.sshfl [vmem:[%s304_s27] sm:$0x33 pattern:$0x76325410]  ;;  %s334_s14 = scalar_lea.vmem %s787_s5, %s638_s11 }
  0x12   : > { %v345_v10 = vcombine.high %v625_v9, %v625_v9  ;;  %v667_v11 = vld [vmem:[%s314_s30] ss:$0 sps:$4 sm:$0xff]   ;;  %348 = vst [vmem:[#allocation2] sm:$0x3] %v625_v9 }
  0x13   : > { %v627_v12 = vld.sshfl [vmem:[%s324_s8] sm:$0x33 pattern:$0x76325410]  ;;  %v359_v14 = vrot.slane %v667_v11, %v358_v8 }
  0x14   : > { %378 = vst [vmem:[#allocation2 + $0x8] sm:$0x30] %v627_v12  ;;  %v374_v13 = vcombine.low %v627_v12, %v627_v12  ;;  %349 = vst [vmem:[#allocation2 + $0x8] sm:$0x3] %v345_v10 }
  0x15   : > { %626 = vst.sshfl [vmem:[#allocation2] sm:$0x30 pattern:$0x76325410] %v667_v11  ;;  %v360_v15 = vcombine.high %v359_v14, %v359_v14 }
  0x16   : > { %377 = vst [vmem:[#allocation2] sm:$0x30] %v374_v13 }
  0x17   : > { %364 = vst [vmem:[#allocation2 + $0x8] sm:$0xc] %v360_v15 }
  0x1d   : > { %v379_v16 = vld [vmem:[#allocation2] sm:$0x3f] }
  0x1e   : > { %v380_v17 = vld [vmem:[#allocation2 + $0x8] sm:$0x3f] }
  0x1f   : > { %628 = vmatprep.subr.msk.mxu0 %vm392_vm0, %v380_v17 }
  0x20   : > { %629 = vmatpush1.msk.msra.mxu0 %vm392_vm0, %v379_v16 }
  0x21   : > { %630 = vmatmul.mubr.msk.f32.vlgmr.msra.gmra.mrb[0].mxu0 %vm388_vm1, %v381_v18 }
  0x88   : > { %v386_v19 = vpop.permute.xlu0 %385 }
  0xf4   : > { %v465_v20 = vpop.f32.mrb[0].mxu0 }
  0xf5   : > { %v466_v21 = vadd.f32 %v465_v20, %v386_v19  ;;  %v467_v22 = vpop.f32.mrb[1].mxu0 }
  0xf6   : > { %v468_v23 = vadd.f32 %v467_v22, %v386_v19 }
  0xf7   : > { %v631_v24 = vmul.f32 -1.442695, %v466_v21 }
  0xf8   : > { %v632_v25 = vmul.f32 -1.442695, %v468_v23 }
  0xf9   : > { %668 = vpow2.f32 %v631_v24 }
  0xfa   : > { %670 = vpow2.f32 %v632_v25 }
 0x103   : > { %v669_v26 = vpop.eup %668 }
 0x104   : > { %v671_v27 = vpop.eup %670  ;;  %v476_v28 = vadd.f32 1.0, %v669_v26 }
 0x105   : > { %v477_v29 = vadd.f32 1.0, %v671_v27 }
 0x106   : > { %672 = vrcp.f32 %v476_v28 }
 0x107   : > { %674 = vrcp.f32 %v477_v29 }
 0x110   : > { %v673_v30 = vpop.eup %672 }
 0x111   : > { %v675_v31 = vpop.eup %674  ;;  %v482_v32 = vmul.f32 %v673_v30, %v466_v21 }
 0x112   : > { %v483_v33 = vmul.f32 %v675_v31, %v468_v23 }
 0x114   : > { %v486_v34 = vcombine.low %v482_v32, %v483_v33 }
 0x116   : > { %488 = vst [vmem:[%s334_s14] sm:$0xff] %v486_v34 }
 0x117 PF: > { %s15_s20 = sadd.s32 1, %s698_s20   ;;  %s788_s18 = smov %s694_s19 }
 0x118   : > { %p12_p5 = scmp.ge.s32.totalorder %s15_s20, 4   ;;  %s789_s19 = smov %s791_s21 }
 0x11a   :  { %14 = sbr.rel (!%p12_p5) target bundleno = 2 (0x2), region = 76 }

// kernel: c2f_simam_forward.5
= control target key start
LH: loop header
LB: loop body
LE: loop exit
PB: predicated region body
PF: predicated region fallthrough
CT: control target
= control target key end

     0   :  { %s789_s18 = smov 0   ;;  %s954_s0 = inlined_call_operand.vmem [shape: f32[2,2,256], index: 0, kind: input, shape index: {}]   ;;  %s955_s1 = inlined_call_operand.vmem [shape: f32[2,18], index: 1, kind: input, shape index: {}]   ;;  %s956_s2 = inlined_call_operand.vmem [shape: f32[2,1], index: 2, kind: input, shape index: {}]   ;;  %s957_s3 = inlined_call_operand.vmem [shape: s32[1,256], index: 3, kind: input, shape index: {}]   ;;  %s958_s4 = inlined_call_operand.vmem [shape: s32[1,256], index: 4, kind: input, shape index: {}]   ;;  %s959_s5 = inlined_call_operand.vmem [shape: f32[2,2,256], index: 5, kind: output, shape index: {}]  }
   0x1 LB: > { %s682_s19 = sadd.s32 4294967295, %s747_s18   ;;  %p686_p0 = scmp.ge.s32.totalorder %s747_s18, 1  ;;  %s747_s18 = sphi %s789_s18, %s15_s18  }
   0x2   : > { %p187_p1 = scmp.lt.s32.totalorder %s747_s18, 3 }
   0x4   : > { %p188_p2 = pnand %p686_p0, %p187_p1 }
   0x5   : > { %p215_p3 = scmp.lt.s32.totalorder (!%p188_p2), %s682_s19, 1  ;;  %v749_v0 = vmov (!%p188_p2), 0.0   ;;  %s750_s24 = smov (!%p188_p2), 15   ;;  %v513_v3 = vld [vmem:[%s956_s2] sm:$0x3] (!%p188_p2)  ;;  %v758_v4 = vmov (!%p188_p2), 0   ;;  %v243_v11 = vlaneseq (!%p188_p2) }
   0x6   : > { %191 = sbr.rel (%p188_p2) target bundleno = 421 (0x1a5), region = 40  ;;  %594 = vmatprep.mubr.f32.mxu0 (!%p188_p2), %v749_v0  ;;  %s751_s25 = smov (!%p188_p2), 16   ;;  %732 = vset.pattern.permute.xlu0 (!%p188_p2), %v758_v4  ;;  %v226_v5 = vld [vmem:[%s957_s3] sm:$0x3] (!%p188_p2) }
   0x7   : > { %s752_s26 = smov (!%p188_p2), 1   ;;  %s753_s27 = smov (!%p188_p2), 127   ;;  %v815_v6 = vld [vmem:[%s958_s4] sm:$0x3] (!%p188_p2)  ;;  %v248_v7 = vadd.s32 (!%p188_p2), 4294967295, %v226_v5  ;;  %vm350_vm2 = vcmp.ge.s32.totalorder (!%p188_p2), %v226_v5, 0 }
   0x8   : > { %s754_s28 = smov (!%p188_p2), 113   ;;  %s755_s29 = smov (!%p188_p2), 112   ;;  %v818_v8 = vadd.s32 (!%p188_p2), 1, %v815_v6  ;;  %v821_v9 = vadd.s32 (!%p188_p2), 4294967295, %v815_v6  ;;  %vm351_vm3 = vcmp.lt.s32.totalorder (!%p188_p2), %v226_v5, 16  ;;  %v261_v13 = vshrl.u32 (!%p188_p2), %v243_v11, 7 }
   0x9   : > { %s756_s30 = smov (!%p188_p2), 17   ;;  %s757_s6 = smov (!%p188_p2), 111   ;;  %vm250_vm0 = vcmp.ge.s32.totalorder (!%p188_p2), %v248_v7, 0  ;;  %vm251_vm1 = vcmp.lt.s32.totalorder (!%p188_p2), %v248_v7, 16  ;;  %vm829_vm7 = vmand (!%p188_p2), %vm350_vm2, %vm351_vm3  ;;  %vm960_vm12 = vcmp.ge.s32.totalorder (!%p188_p2), %v815_v6, 0  ;;  %v419_v14 = vadd.s32 (!%p188_p2), 1, %v226_v5 }
   0xa   : > { %vm823_vm4 = vmand (!%p188_p2), %vm250_vm0, %vm251_vm1  ;;  %vm316_vm5 = vcmp.ge.s32.totalorder (!%p188_p2), %v818_v8, 0  ;;  %vm253_vm6 = vcmp.ge.s32.totalorder (!%p188_p2), %v821_v9, 0  ;;  %vm318_vm9 = vcmp.lt.s32.totalorder (!%p188_p2), %v818_v8, 16  ;;  %vm255_vm10 = vcmp.lt.s32.totalorder (!%p188_p2), %v821_v9, 16 }
   0xb   : > { %vm317_vm8 = vmand (!%p188_p2), %vm823_vm4, %vm316_vm5  ;;  %vm283_vm0 = vcmp.lt.s32.totalorder (!%p188_p2), %v815_v6, 16  ;;  %v853_v15 = vand.u32 (!%p188_p2), 127, %v243_v11  ;;  %v855_v16 = vsub.s32 (!%p188_p2), 0, %v261_v13  ;;  %v857_v17 = vsub.s32 (!%p188_p2), 1, %v261_v13 }
   0xc   : > { %vm353_vm11 = vmand (!%p188_p2), %vm829_vm7, %vm253_vm6  ;;  %vm420_vm2 = vcmp.ge.s32.totalorder (!%p188_p2), %v419_v14, 0  ;;  %vm421_vm3 = vcmp.lt.s32.totalorder (!%p188_p2), %v419_v14, 16 }
   0xd   : > { %s969_s19 = smov (!%p215_p3, %s682_s19), 1  ;;  %vm319_vm13 = vmand %vm317_vm8, %vm318_vm9 }
   0xe   : > { %s708_s20 = sshll.u32 %s969_s19, 2  ;;  %vm354_vm14 = vmand %vm353_vm11, %vm255_vm10  ;;  %v694_v18 = vsel %vm319_vm13, 1.0, %v749_v0  ;;  %vm347_vm13 = vcmp.lt.s32.totalorder %v853_v15, 1 }
   0xf   : > { %s219_s23 = scalar_lea.vmem %s954_s0, %s708_s20  ;;  %vm282_vm15 = vmand %vm823_vm4, %vm960_vm12  ;;  %v695_v21 = vsel %vm354_vm14, 1.0, %v749_v0  ;;  %vm312_vm12 = vcmp.lt.s32.totalorder %v853_v15, 15  ;;  %v326_v22 = vrot.slane %v694_v18, %v855_v16  ;;  %v330_v23 = vrot.slane %v694_v18, %v857_v17  ;;  %s224_s17 = scalar_lea.vmem %s959_s5, %s708_s20 }
  0x10   : > { %v691_v1 = vld.sshfl [vmem:[%s219_s23] sm:$0x33 pattern:$0x76325410]  ;;  %vm387_vm1 = vmand %vm829_vm7, %vm316_vm5  ;;  %v361_v28 = vrot.slane %v695_v21, %v855_v16  ;;  %vm278_vm14 = vcmp.lt.s32.totalorder %v853_v15, 16  ;;  %v365_v31 = vrot.slane %v695_v21, %v857_v17 }
  0x11   : > { %308 = vrot.lane.b32.xlu1 %v691_v1, %s750_s24  ;;  %378 = vst [vmem:[#allocation2 + $0x10] sm:$0x3] %v691_v1  ;;  %274 = vrot.lane.b32.xlu0 %v691_v1, %s751_s25  ;;  %v236_v2 = vcombine.high %v691_v1, %v691_v1  ;;  %vm284_vm8 = vmand %vm282_vm15, %vm283_vm0 }
  0x12   : > { %vm388_vm11 = vmand %vm387_vm1, %vm318_vm9  ;;  %v693_v25 = vsel %vm284_vm8, 1.0, %v749_v0  ;;  %vm384_vm1 = vcmp.lt.s32.totalorder %v853_v15, 127 }
  0x13   : > { %379 = vst [vmem:[#allocation2 + $0x18] sm:$0x3] %v236_v2  ;;  %vm872_vm7 = vmand %vm420_vm2, %vm421_vm3  ;;  %v696_v32 = vsel %vm388_vm11, 1.0, %v749_v0  ;;  %v291_v35 = vrot.slane %v693_v25, %v855_v16  ;;  %v295_v36 = vrot.slane %v693_v25, %v857_v17  ;;  %vm967_vm2 = vcmp.ge.s32.totalorder %v815_v6, 0 }
  0x14   : > { %vm423_vm15 = vmand %vm872_vm7, %vm253_vm6  ;;  %v395_v41 = vrot.slane %v696_v32, %v855_v16  ;;  %v399_v42 = vrot.slane %v696_v32, %v857_v17  ;;  %vm416_vm11 = vcmp.lt.s32.totalorder %v853_v15, 113 }
  0x15   : > { %343 = vrot.lane.b32.xlu0 %v691_v1, %s752_s26  ;;  %310 = vrot.lane.b32.xlu1 %v236_v2, %s750_s24  ;;  %vm455_vm3 = vmand %vm872_vm7, %vm967_vm2 }
  0x16   : > { %vm456_vm8 = vmand %vm455_vm3, %vm283_vm0 }
  0x19   : > { %345 = vrot.lane.b32.xlu1 %v236_v2, %s752_s26  ;;  %276 = vrot.lane.b32.xlu0 %v236_v2, %s751_s25 }
  0x1d   : > { %382 = vrot.lane.b32.xlu1 %v236_v2, %s753_s27  ;;  %380 = vrot.lane.b32.xlu0 %v691_v1, %s753_s27 }
  0x21   : > { %414 = vrot.lane.b32.xlu1 %v236_v2, %s754_s28  ;;  %412 = vrot.lane.b32.xlu0 %v691_v1, %s754_s28 }
  0x25   : > { %450 = vrot.lane.b32.xlu1 %v236_v2, %s755_s29  ;;  %448 = vrot.lane.b32.xlu0 %v691_v1, %s755_s29 }
  0x29   : > { %241 = vrot.lane.b32.xlu1 %v236_v2, %s756_s30  ;;  %239 = vrot.lane.b32.xlu0 %v691_v1, %s756_s30 }
  0x2d   : > { %482 = vrot.lane.b32.xlu1 %v236_v2, %s757_s6  ;;  %480 = vrot.lane.b32.xlu0 %v691_v1, %s757_s6  ;;  %v698_v1 = vsel %vm456_vm8, 1.0, %v749_v0 }
  0x2e   : > { %v463_v9 = vrot.slane %v698_v1, %v855_v16  ;;  %v467_v12 = vrot.slane %v698_v1, %v857_v17 }
  0x31   : > { %516 = vperm.xlu0 %732, %v513_v3  }
  0x83   : > { %v309_v19 = vpop.permute.xlu1 %308  ;;  %v275_v20 = vpop.permute.xlu0 %274 }
  0x87   : > { %v344_v26 = vpop.permute.xlu0 %343  ;;  %v311_v27 = vpop.permute.xlu1 %310 }
  0x88   : > { %v313_v29 = vsel %vm312_vm12, %v309_v19, %v311_v27  ;;  %v314_v30 = vsel %vm312_vm12, %v311_v27, %v309_v19  ;;  %vm424_vm12 = vmand %vm423_vm15, %vm255_vm10 }
  0x89   : > { %v333_v33 = vmul.f32 %v326_v22, %v314_v30  ;;  %v334_v34 = vmul.f32 %v330_v23, %v313_v29  ;;  %v697_v51 = vsel %vm424_vm12, 1.0, %v749_v0 }
  0x8a   : > { %v431_v62 = vrot.slane %v697_v51, %v855_v16  ;;  %v435_v63 = vrot.slane %v697_v51, %v857_v17 }
  0x8b   : > { %v337_v37 = vrot.slane %v333_v33, 4  ;;  %v338_v38 = vrot.slane %v334_v34, 4  ;;  %v346_v39 = vpop.permute.xlu1 %345  ;;  %v277_v40 = vpop.permute.xlu0 %276 }
  0x8c   : > { %v348_v43 = vsel %vm347_vm13, %v344_v26, %v346_v39  ;;  %v349_v44 = vsel %vm347_vm13, %v346_v39, %v344_v26  ;;  %v279_v45 = vsel %vm278_vm14, %v275_v20, %v277_v40  ;;  %v280_v46 = vsel %vm278_vm14, %v277_v40, %v275_v20  ;;  %vm254_vm13 = vmand %vm823_vm4, %vm253_vm6 }
  0x8d   : > { %341 = vst [vmem:[#allocation2] sm:$0x30] %v337_v37  ;;  %342 = vst [vmem:[#allocation2 + $0x8] sm:$0x30] %v338_v38  ;;  %v368_v47 = vmul.f32 %v361_v28, %v349_v44  ;;  %v369_v48 = vmul.f32 %v365_v31, %v348_v43  ;;  %v298_v49 = vmul.f32 %v291_v35, %v280_v46  ;;  %vm452_vm4 = vcmp.lt.s32.totalorder %v853_v15, 112 }
  0x8e   : > { %v299_v50 = vmul.f32 %v295_v36, %v279_v45  ;;  %vm256_vm0 = vmand %vm254_vm13, %vm255_vm10  ;;  %vm519_vm14 = vcmask 146432  }
  0x8f   : > { %v372_v52 = vrot.slane %v368_v47, 2  ;;  %v373_v53 = vrot.slane %v369_v48, 2  ;;  %v302_v54 = vrot.slane %v298_v49, 6  ;;  %v383_v56 = vpop.permute.xlu1 %382  ;;  %v381_v57 = vpop.permute.xlu0 %380  ;;  %vm487_vm6 = vmand %vm872_vm7, %vm316_vm5  ;;  %v692_v13 = vsel %vm256_vm0, 1.0, %v749_v0  ;;  %v506_v47 = vld [vmem:[%s955_s1] sm:$0x3] }
  0x90   : > { %v303_v55 = vrot.slane %v299_v50, 6  ;;  %v385_v58 = vsel %vm384_vm1, %v381_v57, %v383_v56  ;;  %v386_v59 = vsel %vm384_vm1, %v383_v56, %v381_v57  ;;  %vm488_vm10 = vmand %vm487_vm6, %vm318_vm9  ;;  %vm245_vm5 = vcmp.lt.s32.totalorder %v853_v15, 17 }
  0x91   : > { %376 = vst [vmem:[#allocation2] sm:$0xc0] %v372_v52  ;;  %377 = vst [vmem:[#allocation2 + $0x8] sm:$0xc0] %v373_v53  ;;  %v402_v60 = vmul.f32 %v395_v41, %v385_v58  ;;  %v403_v61 = vmul.f32 %v399_v42, %v386_v59  ;;  %v263_v25 = vrot.slane %v692_v13, %v855_v16  ;;  %v699_v27 = vsel %vm488_vm10, 1.0, %v749_v0 }
  0x92   : > { %306 = vst [vmem:[#allocation2] sm:$0xc] %v302_v54  ;;  %307 = vst [vmem:[#allocation2 + $0x8] sm:$0xc] %v303_v55  ;;  %v267_v26 = vrot.slane %v692_v13, %v857_v17  ;;  %vm484_vm9 = vcmp.lt.s32.totalorder %v853_v15, 111  ;;  %v495_v35 = vrot.slane %v699_v27, %v855_v16  ;;  %v499_v36 = vrot.slane %v699_v27, %v857_v17 }
  0x93   : > { %v406_v2 = vrot.slane %v402_v60, 6  ;;  %v407_v3 = vrot.slane %v403_v61, 6  ;;  %v415_v4 = vpop.permute.xlu1 %414  ;;  %v413_v5 = vpop.permute.xlu0 %412  ;;  %vm523_vm7 = vcmask 1041408  }
  0x94   : > { %v417_v6 = vsel %vm416_vm11, %v413_v5, %v415_v4  ;;  %v418_v7 = vsel %vm416_vm11, %v415_v4, %v413_v5 }
  0x95   : > { %410 = vst [vmem:[#allocation2 + $0x10] sm:$0xc] %v406_v2  ;;  %411 = vst [vmem:[#allocation2 + $0x18] sm:$0xc] %v407_v3  ;;  %v438_v10 = vmul.f32 %v431_v62, %v417_v6  ;;  %v439_v11 = vmul.f32 %v435_v63, %v418_v7 }
  0x97   : > { %v442_v14 = vrot.slane %v438_v10, 4  ;;  %v443_v18 = vrot.slane %v439_v11, 4  ;;  %v451_v19 = vpop.permute.xlu1 %450  ;;  %v449_v20 = vpop.permute.xlu0 %448 }
  0x98   : > { %v453_v21 = vsel %vm452_vm4, %v449_v20, %v451_v19  ;;  %v454_v22 = vsel %vm452_vm4, %v451_v19, %v449_v20 }
  0x99   : > { %446 = vst [vmem:[#allocation2 + $0x10] sm:$0x30] %v442_v14  ;;  %447 = vst [vmem:[#allocation2 + $0x18] sm:$0x30] %v443_v18  ;;  %v470_v23 = vmul.f32 %v463_v9, %v453_v21  ;;  %v471_v24 = vmul.f32 %v467_v12, %v454_v22 }
  0x9b   : > { %v474_v28 = vrot.slane %v470_v23, 2  ;;  %v475_v29 = vrot.slane %v471_v24, 2  ;;  %v242_v30 = vpop.permute.xlu1 %241  ;;  %v240_v31 = vpop.permute.xlu0 %239 }
  0x9c   : > { %v246_v8 = vsel %vm245_vm5, %v240_v31, %v242_v30  ;;  %v247_v32 = vsel %vm245_vm5, %v242_v30, %v240_v31 }
  0x9d   : > { %478 = vst [vmem:[#allocation2 + $0x10] sm:$0xc0] %v474_v28  ;;  %479 = vst [vmem:[#allocation2 + $0x18] sm:$0xc0] %v475_v29  ;;  %v270_v33 = vmul.f32 %v263_v25, %v247_v32  ;;  %v271_v34 = vmul.f32 %v267_v26, %v246_v8 }
  0x9f   : > { %272 = vst [vmem:[#allocation2] sm:$0x3] %v270_v33  ;;  %273 = vst [vmem:[#allocation2 + $0x8] sm:$0x3] %v271_v34  ;;  %v483_v37 = vpop.permute.xlu1 %482  ;;  %v481_v0 = vpop.permute.xlu0 %480 }
  0xa0   : > { %v485_v38 = vsel %vm484_vm9, %v481_v0, %v483_v37  ;;  %v486_v39 = vsel %vm484_vm9, %v483_v37, %v481_v0 }
  0xa1   : > { %v502_v40 = vmul.f32 %v495_v35, %v485_v38  ;;  %v503_v41 = vmul.f32 %v499_v36, %v486_v39 }
  0xa3   : > { %504 = vst [vmem:[#allocation2 + $0x20] sm:$0x3] %v502_v40  ;;  %505 = vst [vmem:[#allocation2 + $0x28] sm:$0x3] %v503_v41 }
  0xa4   : > { %v510_v42 = vld [vmem:[#allocation2 + $0x18] sm:$0xff]  ;;  %v509_v44 = vld [vmem:[#allocation2 + $0x10] sm:$0xff] }
  0xa6   : > { %v508_v15 = vld [vmem:[#allocation2 + $0x8] sm:$0xff]  ;;  %v507_v43 = vld [vmem:[#allocation2] sm:$0xff] }
  0xa7   : > { %v710_v45 = vpack.c.bf16 %v510_v42, %v508_v15  ;;  %v712_v46 = vpack.c.bf16 %v509_v44, %v507_v43 }
  0xa9   : > { %711 = vmatprep.subr.bf16.mxu0 %v710_v45 }
  0xaa   : > { %713 = vmatpush1.bf16.msra.mxu0 %v712_v46  ;;  %v512_v16 = vld [vmem:[#allocation2 + $0x28] sm:$0x3]  ;;  %v511_v17 = vld [vmem:[#allocation2 + $0x20] sm:$0x3] }
  0xab   : > { %700 = vmatprep.subr.msk.mxu0 %vm523_vm7, %v512_v16 }
  0xae   : > { %701 = vmatpush1.msk.msra.mxu0 %vm523_vm7, %v511_v17 }
  0xaf   : > { %702 = vmatmul.mubr.msk.f32.vlgmr.msra.gmra.mrb[0].mxu0 %vm519_vm14, %v506_v47 }
  0xb0   : > { %v517_v48 = vpop.permute.xlu0 %516 }
 0x182   : > { %v596_v49 = vpop.f32.mrb[0].mxu0 }
 0x183   : > { %v597_v50 = vadd.f32 %v596_v49, %v517_v48  ;;  %v598_v51 = vpop.f32.mrb[1].mxu0 }
 0x184   : > { %v599_v52 = vadd.f32 %v598_v51, %v517_v48 }
 0x185   : > { %v703_v53 = vmul.f32 -1.442695, %v597_v50 }
 0x186   : > { %v704_v54 = vmul.f32 -1.442695, %v599_v52 }
 0x187   : > { %733 = vpow2.f32 %v703_v53 }
 0x188   : > { %735 = vpow2.f32 %v704_v54 }
 0x191   : > { %v734_v55 = vpop.eup %733 }
 0x192   : > { %v736_v56 = vpop.eup %735  ;;  %v607_v57 = vadd.f32 1.0, %v734_v55 }
 0x193   : > { %v608_v58 = vadd.f32 1.0, %v736_v56 }
 0x194   : > { %737 = vrcp.f32 %v607_v57 }
 0x195   : > { %739 = vrcp.f32 %v608_v58 }
 0x19e   : > { %v738_v59 = vpop.eup %737 }
 0x19f   : > { %v740_v60 = vpop.eup %739  ;;  %v613_v61 = vmul.f32 %v738_v59, %v597_v50 }
 0x1a0   : > { %v614_v62 = vmul.f32 %v740_v60, %v599_v52 }
 0x1a2   : > { %v617_v63 = vcombine.low %v613_v61, %v614_v62 }
 0x1a4   : > { %705 = vst.sshfl [vmem:[%s224_s17] sm:$0x33 pattern:$0x76325410] %v617_v63 }
 0x1a5 PF: > { %s15_s18 = sadd.s32 1, %s747_s18  }
 0x1a6   : > { %p12_p4 = scmp.ge.s32.totalorder %s15_s18, 4  }
 0x1a8   :  { %14 = sbr.rel (!%p12_p4) target bundleno = 1 (0x1), region = 70 }

// kernel: c2f_simam_forward.6
= control target key start
LH: loop header
LB: loop body
LE: loop exit
PB: predicated region body
PF: predicated region fallthrough
CT: control target
= control target key end

     0   :  { %s839_s18 = smov 0   ;;  %s1010_s0 = inlined_call_operand.vmem [shape: f32[2,2,256], index: 0, kind: input, shape index: {}]   ;;  %s1011_s1 = inlined_call_operand.vmem [shape: f32[2,18], index: 1, kind: input, shape index: {}]   ;;  %s1012_s2 = inlined_call_operand.vmem [shape: f32[2,1], index: 2, kind: input, shape index: {}]   ;;  %s1013_s3 = inlined_call_operand.vmem [shape: s32[1,256], index: 3, kind: input, shape index: {}]   ;;  %s1014_s4 = inlined_call_operand.vmem [shape: s32[1,256], index: 4, kind: input, shape index: {}]   ;;  %s1015_s5 = inlined_call_operand.vmem [shape: f32[2,2,256], index: 5, kind: output, shape index: {}]  }
   0x1 LB: > { %s720_s19 = sadd.s32 4294967295, %s797_s18   ;;  %p724_p0 = scmp.ge.s32.totalorder %s797_s18, 1  ;;  %s797_s18 = sphi %s839_s18, %s15_s18  }
   0x2   : > { %p187_p1 = scmp.lt.s32.totalorder %s797_s18, 3 }
   0x4   : > { %p188_p2 = pnand %p724_p0, %p187_p1 }
   0x5   : > { %p215_p3 = scmp.lt.s32.totalorder (!%p188_p2), %s720_s19, 1  ;;  %v799_v0 = vmov (!%p188_p2), 0.0   ;;  %s800_s24 = smov (!%p188_p2), 15   ;;  %v513_v3 = vld [vmem:[%s1012_s2] sm:$0x3] (!%p188_p2)  ;;  %v808_v4 = vmov (!%p188_p2), 0   ;;  %v243_v11 = vlaneseq (!%p188_p2) }
   0x6   : > { %191 = sbr.rel (%p188_p2) target bundleno = 767 (0x2ff), region = 40  ;;  %594 = vmatprep.mubr.f32.mxu0 (!%p188_p2), %v799_v0  ;;  %s801_s25 = smov (!%p188_p2), 16   ;;  %772 = vset.pattern.permute.xlu0 (!%p188_p2), %v808_v4  ;;  %v226_v5 = vld [vmem:[%s1013_s3] sm:$0x3] (!%p188_p2) }
   0x7   : > { %s802_s26 = smov (!%p188_p2), 1   ;;  %s803_s27 = smov (!%p188_p2), 127   ;;  %v865_v6 = vld [vmem:[%s1014_s4] sm:$0x3] (!%p188_p2)  ;;  %v248_v7 = vadd.s32 (!%p188_p2), 4294967295, %v226_v5  ;;  %vm350_vm2 = vcmp.ge.s32.totalorder (!%p188_p2), %v226_v5, 0 }
   0x8   : > { %s804_s28 = smov (!%p188_p2), 113   ;;  %s805_s29 = smov (!%p188_p2), 112   ;;  %v868_v8 = vadd.s32 (!%p188_p2), 1, %v865_v6  ;;  %v871_v9 = vadd.s32 (!%p188_p2), 4294967295, %v865_v6  ;;  %vm351_vm3 = vcmp.lt.s32.totalorder (!%p188_p2), %v226_v5, 16  ;;  %v261_v13 = vshrl.u32 (!%p188_p2), %v243_v11, 7 }
   0x9   : > { %s806_s30 = smov (!%p188_p2), 17   ;;  %s807_s6 = smov (!%p188_p2), 111   ;;  %vm250_vm0 = vcmp.ge.s32.totalorder (!%p188_p2), %v248_v7, 0  ;;  %vm251_vm1 = vcmp.lt.s32.totalorder (!%p188_p2), %v248_v7, 16  ;;  %vm879_vm7 = vmand (!%p188_p2), %vm350_vm2, %vm351_vm3  ;;  %vm1016_vm12 = vcmp.ge.s32.totalorder (!%p188_p2), %v865_v6, 0  ;;  %v419_v14 = vadd.s32 (!%p188_p2), 1, %v226_v5 }
   0xa   : > { %vm873_vm4 = vmand (!%p188_p2), %vm250_vm0, %vm251_vm1  ;;  %vm316_vm5 = vcmp.ge.s32.totalorder (!%p188_p2), %v868_v8, 0  ;;  %vm253_vm6 = vcmp.ge.s32.totalorder (!%p188_p2), %v871_v9, 0  ;;  %vm318_vm9 = vcmp.lt.s32.totalorder (!%p188_p2), %v868_v8, 16  ;;  %vm255_vm10 = vcmp.lt.s32.totalorder (!%p188_p2), %v871_v9, 16 }
   0xb   : > { %vm317_vm8 = vmand (!%p188_p2), %vm873_vm4, %vm316_vm5  ;;  %vm283_vm0 = vcmp.lt.s32.totalorder (!%p188_p2), %v865_v6, 16  ;;  %v903_v15 = vand.u32 (!%p188_p2), 127, %v243_v11  ;;  %v905_v16 = vsub.s32 (!%p188_p2), 0, %v261_v13  ;;  %v907_v17 = vsub.s32 (!%p188_p2), 1, %v261_v13 }
   0xc   : > { %vm353_vm11 = vmand (!%p188_p2), %vm879_vm7, %vm253_vm6  ;;  %vm420_vm2 = vcmp.ge.s32.totalorder (!%p188_p2), %v419_v14, 0  ;;  %vm421_vm3 = vcmp.lt.s32.totalorder (!%p188_p2), %v419_v14, 16 }
   0xd   : > { %s1025_s19 = smov (!%p215_p3, %s720_s19), 1  ;;  %vm319_vm13 = vmand %vm317_vm8, %vm318_vm9 }
   0xe   : > { %s748_s20 = sshll.u32 %s1025_s19, 2  ;;  %vm354_vm14 = vmand %vm353_vm11, %vm255_vm10  ;;  %v732_v18 = vsel %vm319_vm13, 1.0, %v799_v0  ;;  %vm347_vm13 = vcmp.lt.s32.totalorder %v903_v15, 1 }
   0xf   : > { %s219_s23 = scalar_lea.vmem %s1010_s0, %s748_s20  ;;  %vm282_vm15 = vmand %vm873_vm4, %vm1016_vm12  ;;  %v733_v21 = vsel %vm354_vm14, 1.0, %v799_v0  ;;  %vm312_vm12 = vcmp.lt.s32.totalorder %v903_v15, 15  ;;  %v326_v22 = vrot.slane %v732_v18, %v905_v16  ;;  %v330_v23 = vrot.slane %v732_v18, %v907_v17  ;;  %s224_s17 = scalar_lea.vmem %s1015_s5, %s748_s20 }
  0x10   : > { %v729_v1 = vld.sshfl [vmem:[%s219_s23] sm:$0x33 pattern:$0x76325410]  ;;  %vm387_vm1 = vmand %vm879_vm7, %vm316_vm5  ;;  %v361_v28 = vrot.slane %v733_v21, %v905_v16  ;;  %vm278_vm14 = vcmp.lt.s32.totalorder %v903_v15, 16  ;;  %v365_v31 = vrot.slane %v733_v21, %v907_v17 }
  0x11   : > { %308 = vrot.lane.b32.xlu1 %v729_v1, %s800_s24  ;;  %378 = vst [vmem:[#allocation2 + $0x10] sm:$0x3] %v729_v1  ;;  %274 = vrot.lane.b32.xlu0 %v729_v1, %s801_s25  ;;  %v236_v2 = vcombine.high %v729_v1, %v729_v1  ;;  %vm284_vm8 = vmand %vm282_vm15, %vm283_vm0 }
  0x12   : > { %vm388_vm11 = vmand %vm387_vm1, %vm318_vm9  ;;  %v731_v25 = vsel %vm284_vm8, 1.0, %v799_v0  ;;  %vm384_vm1 = vcmp.lt.s32.totalorder %v903_v15, 127 }
  0x13   : > { %379 = vst [vmem:[#allocation2 + $0x18] sm:$0x3] %v236_v2  ;;  %vm922_vm7 = vmand %vm420_vm2, %vm421_vm3  ;;  %v734_v32 = vsel %vm388_vm11, 1.0, %v799_v0  ;;  %v291_v35 = vrot.slane %v731_v25, %v905_v16  ;;  %v295_v36 = vrot.slane %v731_v25, %v907_v17  ;;  %vm1023_vm2 = vcmp.ge.s32.totalorder %v865_v6, 0 }
  0x14   : > { %vm423_vm15 = vmand %vm922_vm7, %vm253_vm6  ;;  %v395_v41 = vrot.slane %v734_v32, %v905_v16  ;;  %v399_v42 = vrot.slane %v734_v32, %v907_v17  ;;  %vm416_vm11 = vcmp.lt.s32.totalorder %v903_v15, 113 }
  0x15   : > { %343 = vrot.lane.b32.xlu0 %v729_v1, %s802_s26  ;;  %310 = vrot.lane.b32.xlu1 %v236_v2, %s800_s24  ;;  %vm455_vm3 = vmand %vm922_vm7, %vm1023_vm2 }
  0x16   : > { %vm456_vm8 = vmand %vm455_vm3, %vm283_vm0 }
  0x19   : > { %345 = vrot.lane.b32.xlu1 %v236_v2, %s802_s26  ;;  %276 = vrot.lane.b32.xlu0 %v236_v2, %s801_s25 }
  0x1d   : > { %382 = vrot.lane.b32.xlu1 %v236_v2, %s803_s27  ;;  %380 = vrot.lane.b32.xlu0 %v729_v1, %s803_s27 }
  0x21   : > { %414 = vrot.lane.b32.xlu1 %v236_v2, %s804_s28  ;;  %412 = vrot.lane.b32.xlu0 %v729_v1, %s804_s28 }
  0x25   : > { %450 = vrot.lane.b32.xlu1 %v236_v2, %s805_s29  ;;  %448 = vrot.lane.b32.xlu0 %v729_v1, %s805_s29 }
  0x29   : > { %241 = vrot.lane.b32.xlu1 %v236_v2, %s806_s30  ;;  %239 = vrot.lane.b32.xlu0 %v729_v1, %s806_s30 }
  0x2d   : > { %482 = vrot.lane.b32.xlu1 %v236_v2, %s807_s6  ;;  %480 = vrot.lane.b32.xlu0 %v729_v1, %s807_s6  ;;  %v736_v1 = vsel %vm456_vm8, 1.0, %v799_v0 }
  0x2e   : > { %v463_v9 = vrot.slane %v736_v1, %v905_v16  ;;  %v467_v12 = vrot.slane %v736_v1, %v907_v17 }
  0x31   : > { %516 = vperm.xlu0 %772, %v513_v3  }
  0x83   : > { %v309_v19 = vpop.permute.xlu1 %308  ;;  %v275_v20 = vpop.permute.xlu0 %274 }
  0x87   : > { %v344_v26 = vpop.permute.xlu0 %343  ;;  %v311_v27 = vpop.permute.xlu1 %310 }
  0x88   : > { %v313_v29 = vsel %vm312_vm12, %v309_v19, %v311_v27  ;;  %v314_v30 = vsel %vm312_vm12, %v311_v27, %v309_v19  ;;  %vm424_vm12 = vmand %vm423_vm15, %vm255_vm10 }
  0x89   : > { %v333_v33 = vmul.f32 %v326_v22, %v314_v30  ;;  %v334_v34 = vmul.f32 %v330_v23, %v313_v29  ;;  %v735_v51 = vsel %vm424_vm12, 1.0, %v799_v0 }
  0x8a   : > { %v431_v62 = vrot.slane %v735_v51, %v905_v16  ;;  %v435_v63 = vrot.slane %v735_v51, %v907_v17 }
  0x8b   : > { %v337_v37 = vrot.slane %v333_v33, 4  ;;  %v338_v38 = vrot.slane %v334_v34, 4  ;;  %v346_v39 = vpop.permute.xlu1 %345  ;;  %v277_v40 = vpop.permute.xlu0 %276 }
  0x8c   : > { %v348_v43 = vsel %vm347_vm13, %v344_v26, %v346_v39  ;;  %v349_v44 = vsel %vm347_vm13, %v346_v39, %v344_v26  ;;  %v279_v45 = vsel %vm278_vm14, %v275_v20, %v277_v40  ;;  %v280_v46 = vsel %vm278_vm14, %v277_v40, %v275_v20  ;;  %vm254_vm13 = vmand %vm873_vm4, %vm253_vm6 }
  0x8d   : > { %341 = vst [vmem:[#allocation2] sm:$0x30] %v337_v37  ;;  %342 = vst [vmem:[#allocation2 + $0x8] sm:$0x30] %v338_v38  ;;  %v368_v47 = vmul.f32 %v361_v28, %v349_v44  ;;  %v369_v48 = vmul.f32 %v365_v31, %v348_v43  ;;  %v298_v49 = vmul.f32 %v291_v35, %v280_v46  ;;  %vm452_vm4 = vcmp.lt.s32.totalorder %v903_v15, 112 }
  0x8e   : > { %v299_v50 = vmul.f32 %v295_v36, %v279_v45  ;;  %vm256_vm0 = vmand %vm254_vm13, %vm255_vm10  ;;  %vm519_vm14 = vcmask 146432  }
  0x8f   : > { %v372_v52 = vrot.slane %v368_v47, 2  ;;  %v373_v53 = vrot.slane %v369_v48, 2  ;;  %v302_v54 = vrot.slane %v298_v49, 6  ;;  %v383_v56 = vpop.permute.xlu1 %382  ;;  %v381_v57 = vpop.permute.xlu0 %380  ;;  %vm487_vm6 = vmand %vm922_vm7, %vm316_vm5  ;;  %v730_v13 = vsel %vm256_vm0, 1.0, %v799_v0  ;;  %v506_v47 = vld [vmem:[%s1011_s1] sm:$0x3] }
  0x90   : > { %v303_v55 = vrot.slane %v299_v50, 6  ;;  %v385_v58 = vsel %vm384_vm1, %v381_v57, %v383_v56  ;;  %v386_v59 = vsel %vm384_vm1, %v383_v56, %v381_v57  ;;  %vm488_vm10 = vmand %vm487_vm6, %vm318_vm9  ;;  %vm245_vm5 = vcmp.lt.s32.totalorder %v903_v15, 17 }
  0x91   : > { %376 = vst [vmem:[#allocation2] sm:$0xc0] %v372_v52  ;;  %377 = vst [vmem:[#allocation2 + $0x8] sm:$0xc0] %v373_v53  ;;  %v402_v60 = vmul.f32 %v395_v41, %v385_v58  ;;  %v403_v61 = vmul.f32 %v399_v42, %v386_v59  ;;  %v263_v25 = vrot.slane %v730_v13, %v905_v16  ;;  %v737_v27 = vsel %vm488_vm10, 1.0, %v799_v0 }
  0x92   : > { %306 = vst [vmem:[#allocation2] sm:$0xc] %v302_v54  ;;  %307 = vst [vmem:[#allocation2 + $0x8] sm:$0xc] %v303_v55  ;;  %v267_v26 = vrot.slane %v730_v13, %v907_v17  ;;  %vm484_vm9 = vcmp.lt.s32.totalorder %v903_v15, 111  ;;  %v495_v35 = vrot.slane %v737_v27, %v905_v16  ;;  %v499_v36 = vrot.slane %v737_v27, %v907_v17 }
  0x93   : > { %v406_v2 = vrot.slane %v402_v60, 6  ;;  %v407_v3 = vrot.slane %v403_v61, 6  ;;  %v415_v4 = vpop.permute.xlu1 %414  ;;  %v413_v5 = vpop.permute.xlu0 %412  ;;  %vm523_vm7 = vcmask 1041408  }
  0x94   : > { %v417_v6 = vsel %vm416_vm11, %v413_v5, %v415_v4  ;;  %v418_v7 = vsel %vm416_vm11, %v415_v4, %v413_v5 }
  0x95   : > { %410 = vst [vmem:[#allocation2 + $0x10] sm:$0xc] %v406_v2  ;;  %411 = vst [vmem:[#allocation2 + $0x18] sm:$0xc] %v407_v3  ;;  %v438_v10 = vmul.f32 %v431_v62, %v417_v6  ;;  %v439_v11 = vmul.f32 %v435_v63, %v418_v7 }
  0x97   : > { %v442_v14 = vrot.slane %v438_v10, 4  ;;  %v443_v18 = vrot.slane %v439_v11, 4  ;;  %v451_v19 = vpop.permute.xlu1 %450  ;;  %v449_v20 = vpop.permute.xlu0 %448 }
  0x98   : > { %v453_v21 = vsel %vm452_vm4, %v449_v20, %v451_v19  ;;  %v454_v22 = vsel %vm452_vm4, %v451_v19, %v449_v20 }
  0x99   : > { %446 = vst [vmem:[#allocation2 + $0x10] sm:$0x30] %v442_v14  ;;  %447 = vst [vmem:[#allocation2 + $0x18] sm:$0x30] %v443_v18  ;;  %v470_v23 = vmul.f32 %v463_v9, %v453_v21  ;;  %v471_v24 = vmul.f32 %v467_v12, %v454_v22 }
  0x9b   : > { %v474_v28 = vrot.slane %v470_v23, 2  ;;  %v475_v29 = vrot.slane %v471_v24, 2  ;;  %v242_v30 = vpop.permute.xlu1 %241  ;;  %v240_v31 = vpop.permute.xlu0 %239 }
  0x9c   : > { %v246_v8 = vsel %vm245_vm5, %v240_v31, %v242_v30  ;;  %v247_v32 = vsel %vm245_vm5, %v242_v30, %v240_v31 }
  0x9d   : > { %478 = vst [vmem:[#allocation2 + $0x10] sm:$0xc0] %v474_v28  ;;  %479 = vst [vmem:[#allocation2 + $0x18] sm:$0xc0] %v475_v29  ;;  %v270_v33 = vmul.f32 %v263_v25, %v247_v32  ;;  %v271_v34 = vmul.f32 %v267_v26, %v246_v8 }
  0x9f   : > { %272 = vst [vmem:[#allocation2] sm:$0x3] %v270_v33  ;;  %273 = vst [vmem:[#allocation2 + $0x8] sm:$0x3] %v271_v34  ;;  %v483_v37 = vpop.permute.xlu1 %482  ;;  %v481_v0 = vpop.permute.xlu0 %480 }
  0xa0   : > { %v485_v38 = vsel %vm484_vm9, %v481_v0, %v483_v37  ;;  %v486_v39 = vsel %vm484_vm9, %v483_v37, %v481_v0 }
  0xa1   : > { %v502_v40 = vmul.f32 %v495_v35, %v485_v38  ;;  %v503_v41 = vmul.f32 %v499_v36, %v486_v39 }
  0xa3   : > { %504 = vst [vmem:[#allocation2 + $0x20] sm:$0x3] %v502_v40  ;;  %505 = vst [vmem:[#allocation2 + $0x28] sm:$0x3] %v503_v41 }
  0xa4   : > { %v510_v42 = vld [vmem:[#allocation2 + $0x18] sm:$0xff]  ;;  %v509_v44 = vld [vmem:[#allocation2 + $0x10] sm:$0xff] }
  0xa6   : > { %v508_v15 = vld [vmem:[#allocation2 + $0x8] sm:$0xff]  ;;  %v507_v43 = vld [vmem:[#allocation2] sm:$0xff] }
  0xa7   : > { %v750_v45 = vpack.c.bf16 %v510_v42, %v508_v15  ;;  %v752_v46 = vpack.c.bf16 %v509_v44, %v507_v43 }
  0xa9   : > { %751 = vmatprep.subr.bf16.mxu0 %v750_v45 }
  0xaa   : > { %753 = vmatpush1.bf16.msra.mxu0 %v752_v46  ;;  %v512_v16 = vld [vmem:[#allocation2 + $0x28] sm:$0x3]  ;;  %v511_v17 = vld [vmem:[#allocation2 + $0x20] sm:$0x3] }
  0xab   : > { %738 = vmatprep.subr.msk.mxu0 %vm523_vm7, %v512_v16 }
  0xae   : > { %739 = vmatpush1.msk.msra.mxu0 %vm523_vm7, %v511_v17 }
  0xaf   : > { %740 = vmatmul.mubr.msk.f32.vlgmr.msra.gmra.mrb[0].mxu0 %vm519_vm14, %v506_v47 }
  0xb0   : > { %v517_v48 = vpop.permute.xlu0 %516 }
 0x182   : > { %v596_v49 = vpop.f32.mrb[0].mxu0 }
 0x183   : > { %v597_v50 = vadd.f32 %v596_v49, %v517_v48  ;;  %v598_v51 = vpop.f32.mrb[1].mxu0 }
 0x184   : > { %v599_v52 = vadd.f32 %v598_v51, %v517_v48 }
 0x185   : > { %v741_v53 = vmul.f32 -1.442695, %v597_v50 }
 0x186   : > { %v742_v54 = vmul.f32 -1.442695, %v599_v52 }
 0x187   : > { %773 = vpow2.f32 %v741_v53 }
 0x188   : > { %775 = vpow2.f32 %v742_v54 }
 0x191   : > { %v774_v55 = vpop.eup %773 }
 0x192   : > { %v776_v56 = vpop.eup %775  ;;  %v607_v57 = vadd.f32 1.0, %v774_v55 }
 0x193   : > { %v608_v58 = vadd.f32 1.0, %v776_v56 }
 0x194   : > { %777 = vrcp.f32 %v607_v57 }
 0x195   : > { %779 = vrcp.f32 %v608_v58 }
 0x19e   : > { %v778_v59 = vpop.eup %777 }
 0x19f   : > { %v780_v60 = vpop.eup %779  ;;  %v613_v61 = vmul.f32 %v778_v59, %v597_v50 }
 0x1a0   : > { %v614_v62 = vmul.f32 %v780_v60, %v599_v52 }
 0x1a1   : > { %v615_v63 = vsel %vm523_vm7, %v613_v61, 0.0 }
 0x1a2   : > { %v616_v1 = vsel %vm523_vm7, %v614_v62, 0.0 }
 0x1a3   : > { %v617_v2 = vadd.f32 %v616_v1, %v615_v63 }
 0x1a5   : > { %618 = vadd.xlane.f32.xlu1 %v617_v2 }
 0x232   : > { %v619_v3 = vpop.xlane.xlu1 %618 }
 0x233   : > { %v621_v4 = vmul.f32 0.00390625, %v619_v3 }
 0x235   : > { %v622_v5 = vsub.f32 %v613_v61, %v621_v4  ;;  %v623_v6 = vsub.f32 %v614_v62, %v621_v4 }
 0x237   : > { %v624_v7 = vmul.f32 %v622_v5, %v622_v5  ;;  %v625_v10 = vmul.f32 %v623_v6, %v623_v6 }
 0x239   : > { %v626_v11 = vsel %vm523_vm7, %v624_v7, 0.0  ;;  %v627_v9 = vsel %vm523_vm7, %v625_v10, 0.0 }
 0x23a   : > { %v628_v12 = vadd.f32 %v627_v9, %v626_v11 }
 0x23c   : > { %629 = vadd.xlane.f32.xlu0 %v628_v12 }
 0x2c9   : > { %v630_v13 = vpop.xlane.xlu0 %629 }
 0x2ca   : > { %v631_v14 = vmul.f32 0.003921569, %v630_v13 }
 0x2cc   : > { %v632_v18 = vadd.f32 0.0001, %v631_v14 }
 0x2ce   : > { %v633_v19 = vmul.f32 4.0, %v632_v18 }
 0x2d0   : > { %781 = vrcp.f32 %v633_v19 }
 0x2da   : > { %v782_v20 = vpop.eup %781 }
 0x2db   : > { %v635_v21 = vmul.f32 %v782_v20, %v624_v7  ;;  %v636_v22 = vmul.f32 %v782_v20, %v625_v10 }
 0x2dd   : > { %v637_v23 = vadd.f32 0.5, %v635_v21  ;;  %v638_v24 = vadd.f32 0.5, %v636_v22 }
 0x2df   : > { %v743_v25 = vmul.f32 -1.442695, %v637_v23  ;;  %v744_v26 = vmul.f32 -1.442695, %v638_v24 }
 0x2e1   : > { %783 = vpow2.f32 %v743_v25 }
 0x2e2   : > { %785 = vpow2.f32 %v744_v26 }
 0x2eb   : > { %v784_v27 = vpop.eup %783 }
 0x2ec   : > { %v786_v28 = vpop.eup %785  ;;  %v645_v29 = vadd.f32 1.0, %v784_v27 }
 0x2ed   : > { %v646_v30 = vadd.f32 1.0, %v786_v28 }
 0x2ee   : > { %787 = vrcp.f32 %v645_v29 }
 0x2ef   : > { %789 = vrcp.f32 %v646_v30 }
 0x2f8   : > { %v788_v31 = vpop.eup %787 }
 0x2f9   : > { %v790_v8 = vpop.eup %789  ;;  %v651_v32 = vmul.f32 %v788_v31, %v613_v61 }
 0x2fa   : > { %v652_v33 = vmul.f32 %v790_v8, %v614_v62 }
 0x2fc   : > { %v655_v34 = vcombine.low %v651_v32, %v652_v33 }
 0x2fe   : > { %745 = vst.sshfl [vmem:[%s224_s17] sm:$0x33 pattern:$0x76325410] %v655_v34 }
 0x2ff PF: > { %s15_s18 = sadd.s32 1, %s797_s18  }
 0x300   : > { %p12_p4 = scmp.ge.s32.totalorder %s15_s18, 4  }
 0x302   :  { %14 = sbr.rel (!%p12_p4) target bundleno = 1 (0x1), region = 70 }

</bundles_post_ra>
